<compile_context>
chip_gen: v5e
topology: v5e:2x2
jax: 0.10.0
libtpu: 0.0.40
codegen_flags: <defaults>
</compile_context>

<pallas_src>
import jax
import jax.numpy as jnp
from jax.experimental import pallas as pl
from jax.experimental.pallas import tpu as pltpu

# ----- module hyper-parameters (CNNFeatureExtractor.__init__) -----
VOCAB_SIZE    = 50
EMBEDDING_DIM = 32
FILTERS       = 16
KERNEL_SIZES  = (3, 4, 5)
OUTPUT_SIZE   = 32
DROPOUT_P     = 0.5            # eval mode -> identity

K_MAX    = max(KERNEL_SIZES)
V_PAD    = 64                  # vocab (50) + zero padding row, rounded up
PAD_ID   = VOCAB_SIZE          # index of a guaranteed-zero row of the padded table
CONV_PAD = 128                 # len(KERNEL_SIZES)*FILTERS = 48 -> lane-dense 128
OUT_PAD  = 128                 # OUTPUT_SIZE = 32 -> lane-dense 128

# ----- example problem sizes -----
NUM_UTT   = 4
BATCH     = 2
NUM_WORDS = 16


def _cnn_kernel(ids_ref, tstack_ref, wstack_ref, cbias_ref, tmask_ref,
                fcw_ref, fcb_ref, umask_ref, out_ref):
    ids = ids_ref[...]                              # (R, K_MAX) int32 (tap-offset ids)
    R, n_taps = ids.shape
    kv = tstack_ref.shape[0]                        # K_MAX * V_PAD
    rows = umask_ref.shape[0]                       # utterance rows in this block
    w = R // rows                                   # words per utterance

    # nn.Embedding gather + im2col as one stacked one-hot matmul (exact, on MXU).
    lanes = jax.lax.broadcasted_iota(jnp.int32, (R, kv), 1)
    hit = lanes == ids[:, 0:1]
    for k in range(1, n_taps):
        hit = jnp.logical_or(hit, lanes == ids[:, k:k + 1])
    semb = jnp.dot(hit.astype(jnp.float32), tstack_ref[...],
                   preferred_element_type=jnp.float32)          # (R, K_MAX*E)

    # All Conv1d's (every kernel size, every tap) as ONE wide lane-dense matmul.
    conv = jnp.dot(semb, wstack_ref[...],
                   preferred_element_type=jnp.float32)          # (R, CONV_PAD)
    conv = jnp.maximum(conv + cbias_ref[...], 0.0)              # bias + F.relu

    # F.max_pool1d over the valid conv length: zero out padded time steps
    # (post-ReLU values are >= 0 so appended zeros never change the max).
    conv = conv.reshape(rows, w, conv.shape[-1]) * tmask_ref[...]
    pooled = jnp.max(conv, axis=1)                              # (rows, CONV_PAD)

    # TODO(synk): nn.Dropout is identity in eval mode; no stochastic mask here.
    feats = jnp.dot(pooled, fcw_ref[...],
                    preferred_element_type=jnp.float32) + fcb_ref[...]
    feats = jnp.maximum(feats, 0.0)                             # F.relu(fc(...))
    out_ref[...] = feats * umask_ref[...]                       # utterance mask


def cnn_feature_extractor(x_ids, umask, params):
    """x_ids: (num_utt, batch, num_words) int32 token ids.
       umask: (batch, num_utt) float mask.
       returns: (batch, num_utt, OUTPUT_SIZE) float32 (matches torch output)."""
    num_utt, batch, num_words = x_ids.shape
    W = num_words
    E = EMBEDDING_DIM
    F = FILTERS
    NR = num_utt * batch

    # --- glue: x.view(-1, num_words); pad rows to a multiple of 8 (sublanes) ---
    x_flat = x_ids.reshape(NR, W).astype(jnp.int32)
    mask_rows = jnp.transpose(umask, (1, 0)).reshape(NR, 1).astype(jnp.float32)
    R8 = ((NR + 7) // 8) * 8
    if R8 != NR:
        x_flat = jnp.concatenate(
            [x_flat, jnp.zeros((R8 - NR, W), jnp.int32)], axis=0)
        mask_rows = jnp.concatenate(
            [mask_rows, jnp.zeros((R8 - NR, 1), jnp.float32)], axis=0)

    # --- im2col on int32 token ids: ids_unfold[n*W+t, k] = token at word t+k ---
    tk = jnp.arange(W)[:, None] + jnp.arange(K_MAX)[None, :]        # (W, K_MAX)
    valid = tk < W
    gath = jnp.take(x_flat, jnp.where(valid, tk, 0), axis=1)        # (R8, W, K_MAX)
    ids_unfold = jnp.where(valid[None, :, :], gath, PAD_ID)
    ids_unfold = ids_unfold + (jnp.arange(K_MAX) * V_PAD)[None, None, :]
    ids_unfold = ids_unfold.reshape(R8 * W, K_MAX).astype(jnp.int32)

    # --- block-diagonal stacked embedding table (row PAD_ID is all zeros) ---
    table = jnp.zeros((V_PAD, E), jnp.float32).at[:VOCAB_SIZE].set(
        params["embedding"].astype(jnp.float32))
    tstack = jnp.zeros((K_MAX * V_PAD, K_MAX * E), jnp.float32)
    for k in range(K_MAX):
        tstack = tstack.at[k * V_PAD:(k + 1) * V_PAD, k * E:(k + 1) * E].set(table)

    # --- consolidated conv weights / bias / valid-time mask (lane-dense) ---
    wstack = jnp.zeros((K_MAX * E, CONV_PAD), jnp.float32)
    cbias = jnp.zeros((1, CONV_PAD), jnp.float32)
    tmask = jnp.zeros((W, CONV_PAD), jnp.float32)
    for i, K in enumerate(KERNEL_SIZES):
        wk = params[f"conv{K}_w"].astype(jnp.float32)     # torch layout (F, E, K)
        bk = params[f"conv{K}_b"].astype(jnp.float32)     # (F,)
        c0 = i * F
        for k in range(K):
            wstack = wstack.at[k * E:(k + 1) * E, c0:c0 + F].set(wk[:, :, k].T)
        cbias = cbias.at[0, c0:c0 + F].set(bk)
        tmask = tmask.at[:W - K + 1, c0:c0 + F].set(1.0)  # valid conv length

    # --- 128-lane-padded FC weights so the kernel output is lane-dense ---
    fcw = jnp.zeros((CONV_PAD, OUT_PAD), jnp.float32)
    fcw = fcw.at[:len(KERNEL_SIZES) * F, :OUTPUT_SIZE].set(
        params["fc_w"].astype(jnp.float32).T)             # torch (out,in) -> (in,out)
    fcb = jnp.zeros((1, OUT_PAD), jnp.float32)
    fcb = fcb.at[0, :OUTPUT_SIZE].set(params["fc_b"].astype(jnp.float32))

    # --- 1-D grid over utterance-row blocks (parallel across TCs on v7x) ---
    if R8 <= 128:
        row_block = R8
    else:
        row_block = max(c for c in (8, 16, 32, 64, 128) if R8 % c == 0)
    grid = (R8 // row_block,)
    r_blk = row_block * W

    def full_spec(arr):
        return pl.BlockSpec(arr.shape, lambda i: (0,) * arr.ndim)

    out = pl.pallas_call(
        _cnn_kernel,
        out_shape=jax.ShapeDtypeStruct((R8, OUT_PAD), jnp.float32),
        grid=grid,
        in_specs=[
            pl.BlockSpec((r_blk, K_MAX), lambda i: (i, 0)),       # token ids
            full_spec(tstack), full_spec(wstack), full_spec(cbias),
            full_spec(tmask), full_spec(fcw), full_spec(fcb),
            pl.BlockSpec((row_block, 1), lambda i: (i, 0)),       # utterance mask
        ],
        out_specs=pl.BlockSpec((row_block, OUT_PAD), lambda i: (i, 0)),
        compiler_params=pltpu.CompilerParams(
            dimension_semantics=("parallel",)),
    )(ids_unfold, tstack, wstack, cbias, tmask, fcw, fcb, mask_rows)

    feats = out[:NR, :OUTPUT_SIZE]                        # drop row/lane padding
    feats = feats.reshape(num_utt, batch, OUTPUT_SIZE)    # features.view(U, B, -1)
    return jnp.transpose(feats, (1, 0, 2))                # .permute(1, 0, 2)


def _reference(x_ids, umask, params):
    """Pure-JAX re-implementation of the PyTorch forward (for verification)."""
    num_utt, batch, W = x_ids.shape
    NR = num_utt * batch
    emb = params["embedding"][x_ids.reshape(NR, W)]               # (NR, W, E)
    pooled = []
    for K in KERNEL_SIZES:
        w = params[f"conv{K}_w"]                                  # (F, E, K)
        b = params[f"conv{K}_b"]
        outs = [jnp.einsum("nke,fek->nf", emb[:, t:t + K, :], w) + b
                for t in range(W - K + 1)]
        conv = jnp.stack(outs, axis=1)                            # (NR, L, F)
        pooled.append(jnp.max(jax.nn.relu(conv), axis=1))
    cat = jnp.concatenate(pooled, axis=1)                         # (NR, 48)
    feats = jax.nn.relu(cat @ params["fc_w"].T + params["fc_b"])
    feats = feats.reshape(num_utt, batch, OUTPUT_SIZE)
    feats = feats * jnp.transpose(umask, (1, 0))[:, :, None]
    return jnp.transpose(feats, (1, 0, 2))


def init_params(key):
    keys = jax.random.split(key, 9)

    def norm(k, shape, scale=0.1):
        return (scale * jax.random.normal(k, shape)).astype(jnp.float32)

    params = {
        # nn.Embedding(vocab, emb_dim)
        "embedding": norm(keys[0], (VOCAB_SIZE, EMBEDDING_DIM), 1.0),
        # nn.Linear(len(K)*F, output_size) (torch layout: (out, in))
        "fc_w": norm(keys[7], (OUTPUT_SIZE, len(KERNEL_SIZES) * FILTERS)),
        "fc_b": norm(keys[8], (OUTPUT_SIZE,)),
    }
    for i, K in enumerate(KERNEL_SIZES):
        # nn.Conv1d(E, F, K) (torch layout: (F, E, K))
        params[f"conv{K}_w"] = norm(keys[1 + 2 * i], (FILTERS, EMBEDDING_DIM, K))
        params[f"conv{K}_b"] = norm(keys[2 + 2 * i], (FILTERS,))
    return params


if __name__ == "__main__":
    key = jax.random.PRNGKey(0)
    k_param, k_x, k_mask = jax.random.split(key, 3)

    params = init_params(k_param)
    x_ids = jax.random.randint(k_x, (NUM_UTT, BATCH, NUM_WORDS),
                               0, VOCAB_SIZE, dtype=jnp.int32)
    umask = (jax.random.uniform(k_mask, (BATCH, NUM_UTT)) > 0.3).astype(jnp.float32)

    feats = cnn_feature_extractor(x_ids, umask, params)
    feats = jax.block_until_ready(feats)
    assert feats.shape == (BATCH, NUM_UTT, OUTPUT_SIZE)
    assert feats.dtype == jnp.float32

    ref = jax.block_until_ready(_reference(x_ids, umask, params))
    assert jnp.allclose(feats, ref, atol=1e-4, rtol=1e-4), \
        float(jnp.max(jnp.abs(feats - ref)))
    print("KERNEL_OK")
</pallas_src>

<mosaic_0001>
module attributes {stable_mosaic.version = 11 : i64} {
  func.func @_cnn_kernel(%arg0: i32, %arg1: memref<128x5xi32, #tpu.memory_space<vmem>>, %arg2: memref<320x160xf32, #tpu.memory_space<vmem>>, %arg3: memref<160x128xf32, #tpu.memory_space<vmem>>, %arg4: memref<1x128xf32, #tpu.memory_space<vmem>>, %arg5: memref<16x128xf32, #tpu.memory_space<vmem>>, %arg6: memref<128x128xf32, #tpu.memory_space<vmem>>, %arg7: memref<1x128xf32, #tpu.memory_space<vmem>>, %arg8: memref<8x1xf32, #tpu.memory_space<vmem>>, %arg9: memref<8x128xf32, #tpu.memory_space<vmem>>) attributes {dimension_semantics = [#tpu.dimension_semantics<parallel>], iteration_bounds = array<i64: 1>, scalar_prefetch = 0 : i64, scratch_operands = 0 : i64, tpu.core_type = #tpu.core_type<tc>, window_params = [{transform_indices = @transform_0, window_bounds = array<i64: 128, 5>}, {pipeline_mode = #tpu.pipeline_mode<synchronous>, transform_indices = @transform_1, window_bounds = array<i64: 320, 160>}, {pipeline_mode = #tpu.pipeline_mode<synchronous>, transform_indices = @transform_2, window_bounds = array<i64: 160, 128>}, {pipeline_mode = #tpu.pipeline_mode<synchronous>, transform_indices = @transform_3, window_bounds = array<i64: 1, 128>}, {pipeline_mode = #tpu.pipeline_mode<synchronous>, transform_indices = @transform_4, window_bounds = array<i64: 16, 128>}, {pipeline_mode = #tpu.pipeline_mode<synchronous>, transform_indices = @transform_5, window_bounds = array<i64: 128, 128>}, {pipeline_mode = #tpu.pipeline_mode<synchronous>, transform_indices = @transform_6, window_bounds = array<i64: 1, 128>}, {transform_indices = @transform_7, window_bounds = array<i64: 8, 1>}, {transform_indices = @transform_8, window_bounds = array<i64: 8, 128>}]} {
    %c0 = arith.constant 0 : index
    %c0_0 = arith.constant 0 : index
    %0 = vector.load %arg1[%c0, %c0_0] : memref<128x5xi32, #tpu.memory_space<vmem>>, vector<128x5xi32>
    %1 = tpu.iota {dimensions = array<i32: 1>} : vector<128x320xi32>
    %2 = vector.extract_strided_slice %0 {offsets = [0, 0], sizes = [128, 1], strides = [1, 1]} : vector<128x5xi32> to vector<128x1xi32>
    %3 = vector.broadcast %2 : vector<128x1xi32> to vector<128x320xi32>
    %4 = arith.cmpi eq, %1, %3 : vector<128x320xi32>
    %5 = vector.extract_strided_slice %0 {offsets = [0, 1], sizes = [128, 1], strides = [1, 1]} : vector<128x5xi32> to vector<128x1xi32>
    %6 = vector.broadcast %5 : vector<128x1xi32> to vector<128x320xi32>
    %7 = arith.cmpi eq, %1, %6 : vector<128x320xi32>
    %8 = arith.ori %4, %7 : vector<128x320xi1>
    %9 = vector.extract_strided_slice %0 {offsets = [0, 2], sizes = [128, 1], strides = [1, 1]} : vector<128x5xi32> to vector<128x1xi32>
    %10 = vector.broadcast %9 : vector<128x1xi32> to vector<128x320xi32>
    %11 = arith.cmpi eq, %1, %10 : vector<128x320xi32>
    %12 = arith.ori %8, %11 : vector<128x320xi1>
    %13 = vector.extract_strided_slice %0 {offsets = [0, 3], sizes = [128, 1], strides = [1, 1]} : vector<128x5xi32> to vector<128x1xi32>
    %14 = vector.broadcast %13 : vector<128x1xi32> to vector<128x320xi32>
    %15 = arith.cmpi eq, %1, %14 : vector<128x320xi32>
    %16 = arith.ori %12, %15 : vector<128x320xi1>
    %17 = vector.extract_strided_slice %0 {offsets = [0, 4], sizes = [128, 1], strides = [1, 1]} : vector<128x5xi32> to vector<128x1xi32>
    %18 = vector.broadcast %17 : vector<128x1xi32> to vector<128x320xi32>
    %19 = arith.cmpi eq, %1, %18 : vector<128x320xi32>
    %20 = arith.ori %16, %19 : vector<128x320xi1>
    %21 = arith.extui %20 : vector<128x320xi1> to vector<128x320xi32>
    %22 = arith.sitofp %21 : vector<128x320xi32> to vector<128x320xf32>
    %c0_1 = arith.constant 0 : index
    %c0_2 = arith.constant 0 : index
    %23 = vector.load %arg2[%c0_1, %c0_2] : memref<320x160xf32, #tpu.memory_space<vmem>>, vector<320x160xf32>
    %cst = arith.constant dense<0.000000e+00> : vector<128x160xf32>
    %24 = tpu.matmul %22, %23, %cst {dimension_numbers = #tpu.dot_dimension_numbers<[1], [0], [0], [1], [0, 0, 1, 1], [], []>} : vector<128x320xf32>, vector<320x160xf32>, vector<128x160xf32> -> vector<128x160xf32>
    %c0_3 = arith.constant 0 : index
    %c0_4 = arith.constant 0 : index
    %25 = vector.load %arg3[%c0_3, %c0_4] : memref<160x128xf32, #tpu.memory_space<vmem>>, vector<160x128xf32>
    %cst_5 = arith.constant dense<0.000000e+00> : vector<128x128xf32>
    %26 = tpu.matmul %24, %25, %cst_5 {dimension_numbers = #tpu.dot_dimension_numbers<[1], [0], [0], [1], [0, 0, 1, 1], [], []>} : vector<128x160xf32>, vector<160x128xf32>, vector<128x128xf32> -> vector<128x128xf32>
    %c0_6 = arith.constant 0 : index
    %c0_7 = arith.constant 0 : index
    %27 = vector.load %arg4[%c0_6, %c0_7] : memref<1x128xf32, #tpu.memory_space<vmem>>, vector<1x128xf32>
    %28 = vector.broadcast %27 : vector<1x128xf32> to vector<128x128xf32>
    %29 = arith.addf %26, %28 : vector<128x128xf32>
    %cst_8 = arith.constant 0.000000e+00 : f32
    %30 = vector.broadcast %cst_8 : f32 to vector<128x128xf32>
    %31 = arith.maximumf %29, %30 : vector<128x128xf32>
    %32 = vector.shape_cast %31 : vector<128x128xf32> to vector<8x16x128xf32>
    %c0_9 = arith.constant 0 : index
    %c0_10 = arith.constant 0 : index
    %33 = vector.load %arg5[%c0_9, %c0_10] : memref<16x128xf32, #tpu.memory_space<vmem>>, vector<16x128xf32>
    %34 = vector.shape_cast %33 : vector<16x128xf32> to vector<1x16x128xf32>
    %35 = vector.broadcast %34 : vector<1x16x128xf32> to vector<8x16x128xf32>
    %36 = arith.mulf %32, %35 : vector<8x16x128xf32>
    %cst_11 = arith.constant dense<0xFF800000> : vector<8x128xf32>
    %37 = vector.multi_reduction <maximumf>, %36, %cst_11 [1] : vector<8x16x128xf32> to vector<8x128xf32>
    %c0_12 = arith.constant 0 : index
    %c0_13 = arith.constant 0 : index
    %38 = vector.load %arg6[%c0_12, %c0_13] : memref<128x128xf32, #tpu.memory_space<vmem>>, vector<128x128xf32>
    %cst_14 = arith.constant dense<0.000000e+00> : vector<8x128xf32>
    %39 = tpu.matmul %37, %38, %cst_14 {dimension_numbers = #tpu.dot_dimension_numbers<[1], [0], [0], [1], [0, 0, 1, 1], [], []>} : vector<8x128xf32>, vector<128x128xf32>, vector<8x128xf32> -> vector<8x128xf32>
    %c0_15 = arith.constant 0 : index
    %c0_16 = arith.constant 0 : index
    %40 = vector.load %arg7[%c0_15, %c0_16] : memref<1x128xf32, #tpu.memory_space<vmem>>, vector<1x128xf32>
    %41 = vector.broadcast %40 : vector<1x128xf32> to vector<8x128xf32>
    %42 = arith.addf %39, %41 : vector<8x128xf32>
    %cst_17 = arith.constant 0.000000e+00 : f32
    %43 = vector.broadcast %cst_17 : f32 to vector<8x128xf32>
    %44 = arith.maximumf %42, %43 : vector<8x128xf32>
    %c0_18 = arith.constant 0 : index
    %c0_19 = arith.constant 0 : index
    %45 = vector.load %arg8[%c0_18, %c0_19] : memref<8x1xf32, #tpu.memory_space<vmem>>, vector<8x1xf32>
    %46 = vector.broadcast %45 : vector<8x1xf32> to vector<8x128xf32>
    %47 = arith.mulf %44, %46 : vector<8x128xf32>
    %c0_20 = arith.constant 0 : index
    %c0_21 = arith.constant 0 : index
    %48 = vector.load %arg9[%c0_20, %c0_21] : memref<8x128xf32, #tpu.memory_space<vmem>>, vector<8x128xf32>
    tpu.vector_store %arg9[%c0_20, %c0_21], %47 {strides = array<i32>} : memref<8x128xf32, #tpu.memory_space<vmem>>, vector<8x128xf32>,
    return
  }
  func.func @transform_0(%arg0: i32) -> (i32, i32) {
    %c0_i32 = arith.constant 0 : i32
    %c0_i32_0 = arith.constant 0 : i32
    return %arg0, %c0_i32 : i32, i32
  }
  func.func @transform_1(%arg0: i32) -> (i32, i32) {
    %c0_i32 = arith.constant 0 : i32
    %c0_i32_0 = arith.constant 0 : i32
    %c0_i32_1 = arith.constant 0 : i32
    return %c0_i32, %c0_i32_0 : i32, i32
  }
  func.func @transform_2(%arg0: i32) -> (i32, i32) {
    %c0_i32 = arith.constant 0 : i32
    %c0_i32_0 = arith.constant 0 : i32
    %c0_i32_1 = arith.constant 0 : i32
    return %c0_i32, %c0_i32_0 : i32, i32
  }
  func.func @transform_3(%arg0: i32) -> (i32, i32) {
    %c0_i32 = arith.constant 0 : i32
    %c0_i32_0 = arith.constant 0 : i32
    %c0_i32_1 = arith.constant 0 : i32
    return %c0_i32, %c0_i32_0 : i32, i32
  }
  func.func @transform_4(%arg0: i32) -> (i32, i32) {
    %c0_i32 = arith.constant 0 : i32
    %c0_i32_0 = arith.constant 0 : i32
    %c0_i32_1 = arith.constant 0 : i32
    return %c0_i32, %c0_i32_0 : i32, i32
  }
  func.func @transform_5(%arg0: i32) -> (i32, i32) {
    %c0_i32 = arith.constant 0 : i32
    %c0_i32_0 = arith.constant 0 : i32
    %c0_i32_1 = arith.constant 0 : i32
    return %c0_i32, %c0_i32_0 : i32, i32
  }
  func.func @transform_6(%arg0: i32) -> (i32, i32) {
    %c0_i32 = arith.constant 0 : i32
    %c0_i32_0 = arith.constant 0 : i32
    %c0_i32_1 = arith.constant 0 : i32
    return %c0_i32, %c0_i32_0 : i32, i32
  }
  func.func @transform_7(%arg0: i32) -> (i32, i32) {
    %c0_i32 = arith.constant 0 : i32
    %c0_i32_0 = arith.constant 0 : i32
    return %arg0, %c0_i32 : i32, i32
  }
  func.func @transform_8(%arg0: i32) -> (i32, i32) {
    %c0_i32 = arith.constant 0 : i32
    %c0_i32_0 = arith.constant 0 : i32
    return %arg0, %c0_i32 : i32, i32
  }
}

</mosaic_0001>

<bundles_post_ra>
// kernel: tpu_custom_call.1
= control target key start
LH: loop header
LB: loop body
LE: loop exit
PB: predicated region body
PF: predicated region fallthrough
CT: control target
= control target key end

     0   :  { %v1920_v1 = vmov 2   ;;  %v1921_v2 = vmov 0   ;;  %s3266_s0 = inlined_call_operand.vmem [shape: s32[128,5], index: 0, kind: input, shape index: {}]   ;;  %s3267_s1 = inlined_call_operand.vmem [shape: f32[320,160], index: 1, kind: input, shape index: {}]   ;;  %s3268_s2 = inlined_call_operand.vmem [shape: f32[160,128], index: 2, kind: input, shape index: {}]   ;;  %s3269_s3 = inlined_call_operand.vmem [shape: f32[1,128], index: 3, kind: input, shape index: {}]   ;;  %s3270_s4 = inlined_call_operand.vmem [shape: f32[16,128], index: 4, kind: input, shape index: {}]   ;;  %s3271_s5 = inlined_call_operand.vmem [shape: f32[128,128], index: 5, kind: input, shape index: {}]   ;;  %s3272_s6 = inlined_call_operand.vmem [shape: f32[1,128], index: 6, kind: input, shape index: {}]   ;;  %s3273_s7 = inlined_call_operand.vmem [shape: f32[8,1], index: 7, kind: input, shape index: {}]   ;;  %s3274_s8 = inlined_call_operand.hbm [shape: f32[8,128], index: 8, kind: output, shape index: {}]  }
   0x1   :  { %v30_v0 = vld [vmem:[%s3266_s0] sm:$0xff]  ;;  %1822 = vset.pattern.permute.xlu1 %v1920_v1  ;;  %1821 = vset.pattern.permute.xlu0 %v1921_v2 }
   0x2   :  { %291 = vperm.xlu1 %1822, %v30_v0   ;;  %51 = vperm.xlu0 %1821, %v30_v0  }
   0x3   :  { %13 = vsyncpa [#allocation3], 0  ;;  %v1922_v3 = vmov 4   ;;  %v31_v4 = vld [vmem:[%s3266_s0 + $0x8] sm:$0xff]  ;;  %v1923_v5 = vmov 3   ;;  %v32_v6 = vld [vmem:[%s3266_s0 + $0x10] sm:$0xff] }
   0x4   :  { %1824 = vset.pattern.permute.xlu2 %v1922_v3  ;;  %v1924_v7 = vmov 1   ;;  %v33_v8 = vld [vmem:[%s3266_s0 + $0x18] sm:$0xff]  ;;  %v34_v9 = vld [vmem:[%s3266_s0 + $0x20] sm:$0xff]  ;;  %v35_v10 = vld [vmem:[%s3266_s0 + $0x28] sm:$0xff]  ;;  %s1926_s21 = smov [#allocation2]   ;;  %s1709_s24 = sshll.u32 %s3274_s8, 4  ;;  %s1710_s24 = int_to_ptr.hbm [resolvable:$true] %s1709_s24 }
   0x5   :  { %579 = vperm.xlu2 %1824, %v30_v0   ;;  %v2013_v11 = vld [vmem:[%s3266_s0 + $0x30] sm:$0xff]  ;;  %v849_v14 = vld [vmem:[%s3267_s1 + $0xf8] sm:$0xff]  ;;  %v846_v16 = vld [vmem:[%s3267_s1 + $0xe0] sm:$0xff] }
   0x6   :  { %v848_v12 = vld [vmem:[%s3267_s1 + $0xf0] sm:$0xff]  ;;  %v2033_v15 = vld [vmem:[%s3266_s0 + $0x38] sm:$0xff]  ;;  %1142 = vmatpush.msra.mxu3 %v849_v14  ;;  %v878_v17 = vld [vmem:[%s3267_s1 + $0x1e0] sm:$0xff] }
   0x7   :  { %v880_v13 = vld [vmem:[%s3267_s1 + $0x1f0] sm:$0xff]  ;;  %947 = vmatpush.msra.mxu0 %v848_v12  ;;  %v847_v18 = vld [vmem:[%s3267_s1 + $0xe8] sm:$0xff]  ;;  %v845_v21 = vld [vmem:[%s3267_s1 + $0xd8] sm:$0xff] }
   0x8   :  { %1012 = vmatpush.msra.mxu1 %v880_v13  ;;  %v844_v19 = vld [vmem:[%s3267_s1 + $0xd0] sm:$0xff]  ;;  %1143 = vmatpush.msra.mxu3 %v847_v18  ;;  %v842_v22 = vld [vmem:[%s3267_s1 + $0xc0] sm:$0xff]  ;;  %v843_v24 = vld [vmem:[%s3267_s1 + $0xc8] sm:$0xff] }
   0x9   :  { %948 = vmatpush.msra.mxu0 %v846_v16  ;;  %v876_v20 = vld [vmem:[%s3267_s1 + $0x1d0] sm:$0xff]  ;;  %v874_v23 = vld [vmem:[%s3267_s1 + $0x1c0] sm:$0xff]  ;;  %v841_v27 = vld [vmem:[%s3267_s1 + $0xb8] sm:$0xff] }
   0xa   :  { %1823 = vset.pattern.permute.xlu1 %v1923_v5  ;;  %1828 = vset.pattern.permute.xlu0 %v1923_v5  ;;  %v840_v25 = vld [vmem:[%s3267_s1 + $0xb0] sm:$0xff]  ;;  %v838_v29 = vld [vmem:[%s3267_s1 + $0xa0] sm:$0xff]  ;;  %v839_v31 = vld [vmem:[%s3267_s1 + $0xa8] sm:$0xff] }
   0xb   :  { %435 = vperm.xlu1 %1823, %v30_v0   ;;  %438 = vperm.xlu0 %1828, %v31_v4   ;;  %v872_v26 = vld [vmem:[%s3267_s1 + $0x1b0] sm:$0xff]  ;;  %v870_v30 = vld [vmem:[%s3267_s1 + $0x1a0] sm:$0xff]  ;;  %v837_v34 = vld [vmem:[%s3267_s1 + $0x98] sm:$0xff] }
   0xc   :  { %1013 = vmatpush.msra.mxu1 %v878_v17  ;;  %949 = vmatpush.msra.mxu0 %v844_v19  ;;  %v836_v32 = vld [vmem:[%s3267_s1 + $0x90] sm:$0xff]  ;;  %v834_v35 = vld [vmem:[%s3267_s1 + $0x80] sm:$0xff]  ;;  %v835_v37 = vld [vmem:[%s3267_s1 + $0x88] sm:$0xff] }
   0xd   :  { %1825 = vset.pattern.permute.xlu2 %v1921_v2  ;;  %1144 = vmatpush.msra.mxu3 %v845_v21  ;;  %v868_v33 = vld [vmem:[%s3267_s1 + $0x190] sm:$0xff]  ;;  %v866_v36 = vld [vmem:[%s3267_s1 + $0x180] sm:$0xff]  ;;  %v833_v41 = vld [vmem:[%s3267_s1 + $0x78] sm:$0xff]  ;;  %v46_v21 = vlaneseq }
   0xe   :  { %54 = vperm.xlu2 %1825, %v31_v4   ;;  %1014 = vmatpush.msra.mxu1 %v876_v20  ;;  %v832_v38 = vld [vmem:[%s3267_s1 + $0x70] sm:$0xff]  ;;  %v830_v42 = vld [vmem:[%s3267_s1 + $0x60] sm:$0xff]  ;;  %v831_v45 = vld [vmem:[%s3267_s1 + $0x68] sm:$0xff] }
   0xf   :  { %950 = vmatpush.msra.mxu0 %v842_v22  ;;  %1145 = vmatpush.msra.mxu3 %v843_v24  ;;  %v864_v39 = vld [vmem:[%s3267_s1 + $0x170] sm:$0xff]  ;;  %v862_v43 = vld [vmem:[%s3267_s1 + $0x160] sm:$0xff]  ;;  %v829_v51 = vld [vmem:[%s3267_s1 + $0x58] sm:$0xff]  ;;  %v2242_v22 = vand.u32 127, %v46_v21 }
  0x10   :  { %1015 = vmatpush.msra.mxu1 %v874_v23  ;;  %v896_v40 = vld [vmem:[%s3267_s1 + $0x270] sm:$0xff]  ;;  %v894_v44 = vld [vmem:[%s3267_s1 + $0x260] sm:$0xff]  ;;  %v827_v55 = vld [vmem:[%s3267_s1 + $0x48] sm:$0xff] }
  0x11   :  { %951 = vmatpush.msra.mxu0 %v840_v25  ;;  %1146 = vmatpush.msra.mxu3 %v841_v27  ;;  %v2137_v47 = vld [vmem:[%s3266_s0 + $0x40] sm:$0xff]  ;;  %v828_v48 = vld [vmem:[%s3267_s1 + $0x50] sm:$0xff]  ;;  %v825_v59 = vld [vmem:[%s3267_s1 + $0x38] sm:$0xff]  ;;  %v2249_v25 = vadd.s32 256, %v2242_v22  ;;  %v2255_v27 = vadd.s32 128, %v2242_v22 }
  0x12   :  { %1016 = vmatpush.msra.mxu1 %v872_v26  ;;  %1085 = vmatpush.msra.mxu2 %v896_v40  ;;  %v860_v49 = vld [vmem:[%s3267_s1 + $0x150] sm:$0xff]  ;;  %v826_v52 = vld [vmem:[%s3267_s1 + $0x40] sm:$0xff]  ;;  %v819_v16 = vld [vmem:[%s3267_s1 + $0x8] sm:$0xff] }
  0x13   :  { %1826 = vset.pattern.permute.xlu1 %v1924_v7  ;;  %441 = vperm.xlu0 %1828, %v32_v6   ;;  %v892_v50 = vld [vmem:[%s3267_s1 + $0x250] sm:$0xff]  ;;  %v858_v53 = vld [vmem:[%s3267_s1 + $0x140] sm:$0xff]  ;;  %v2229_v17 = vld [vmem:[%s3266_s0 + $0x48] sm:$0xff] }
  0x14   :  { %150 = vperm.xlu1 %1826, %v31_v4   ;;  %952 = vmatpush.msra.mxu0 %v838_v29  ;;  %v890_v54 = vld [vmem:[%s3267_s1 + $0x240] sm:$0xff]  ;;  %v824_v56 = vld [vmem:[%s3267_s1 + $0x30] sm:$0xff]  ;;  %v2350_v40 = vld [vmem:[%s3266_s0 + $0x58] sm:$0xff] }
  0x15   :  { %1017 = vmatpush.msra.mxu1 %v870_v30  ;;  %1147 = vmatpush.msra.mxu3 %v839_v31  ;;  %v856_v57 = vld [vmem:[%s3267_s1 + $0x130] sm:$0xff]  ;;  %v822_v60 = vld [vmem:[%s3267_s1 + $0x20] sm:$0xff] }
  0x16   :  { %1827 = vset.pattern.permute.xlu2 %v1920_v1  ;;  %953 = vmatpush.msra.mxu0 %v836_v32  ;;  %v888_v58 = vld [vmem:[%s3267_s1 + $0x230] sm:$0xff]  ;;  %v854_v61 = vld [vmem:[%s3267_s1 + $0x120] sm:$0xff] }
  0x17   :  { %294 = vperm.xlu2 %1827, %v31_v4   ;;  %1018 = vmatpush.msra.mxu1 %v868_v33  ;;  %v886_v63 = vld [vmem:[%s3267_s1 + $0x220] sm:$0xff]  ;;  %v2284_v30 = vld [vmem:[%s3266_s0 + $0x50] sm:$0xff] }
  0x18   :  { %1148 = vmatpush.msra.mxu3 %v837_v34  ;;  %954 = vmatpush.msra.mxu0 %v834_v35  ;;  %v818_v12 = vld [vmem:[%s3267_s1] sm:$0xff] }
  0x19   :  { %1019 = vmatpush.msra.mxu1 %v866_v36  ;;  %1086 = vmatpush.msra.mxu2 %v894_v44  ;;  %v850_v13 = vld [vmem:[%s3267_s1 + $0x100] sm:$0xff] }
  0x1a   :  { %1149 = vmatpush.msra.mxu3 %v835_v37  ;;  %955 = vmatpush.msra.mxu0 %v832_v38  ;;  %v882_v14 = vld [vmem:[%s3267_s1 + $0x200] sm:$0xff]  ;;  %v1925_v37 = vmov 0.0  }
  0x1b   :  { %1833 = vset.pattern.permute.xlu0 %v1924_v7  ;;  %1020 = vmatpush.msra.mxu1 %v864_v39 }
  0x1c   :  { %1829 = vset.pattern.permute.xlu1 %v1922_v3  ;;  %147 = vperm.xlu0 %1833, %v30_v0  }
  0x1d   :  { %582 = vperm.xlu1 %1829, %v31_v4   ;;  %1150 = vmatpush.msra.mxu3 %v833_v41 }
  0x1e   :  { %956 = vmatpush.msra.mxu0 %v830_v42  ;;  %1021 = vmatpush.msra.mxu1 %v862_v43 }
  0x1f   :  { %1830 = vset.pattern.permute.xlu2 %v1921_v2  ;;  %1151 = vmatpush.msra.mxu3 %v831_v45 }
  0x20   :  { %57 = vperm.xlu2 %1830, %v32_v6   ;;  %957 = vmatpush.msra.mxu0 %v828_v48 }
  0x21   :  { %1022 = vmatpush.msra.mxu1 %v860_v49  ;;  %1087 = vmatpush.msra.mxu2 %v892_v50 }
  0x22   :  { %1152 = vmatpush.msra.mxu3 %v829_v51  ;;  %958 = vmatpush.msra.mxu0 %v826_v52 }
  0x23   :  { %1023 = vmatpush.msra.mxu1 %v858_v53  ;;  %1088 = vmatpush.msra.mxu2 %v890_v54  ;;  %v2453_v53 = vld [vmem:[%s3266_s0 + $0x60] sm:$0xff] }
  0x24   :  { %156 = vperm.xlu0 %1833, %v33_v8   ;;  %1153 = vmatpush.msra.mxu3 %v827_v55 }
  0x25   :  { %1831 = vset.pattern.permute.xlu1 %v1924_v7  ;;  %959 = vmatpush.msra.mxu0 %v824_v56 }
  0x26   :  { %153 = vperm.xlu1 %1831, %v32_v6   ;;  %1024 = vmatpush.msra.mxu1 %v856_v57 }
  0x27   :  { %1089 = vmatpush.msra.mxu2 %v888_v58  ;;  %1154 = vmatpush.msra.mxu3 %v825_v59 }
  0x28   :  { %1832 = vset.pattern.permute.xlu2 %v1920_v1  ;;  %960 = vmatpush.msra.mxu0 %v822_v60 }
  0x29   :  { %297 = vperm.xlu2 %1832, %v32_v6   ;;  %1025 = vmatpush.msra.mxu1 %v854_v61 }
  0x2a   :  { %1090 = vmatpush.msra.mxu2 %v886_v63 }
  0x2c   :  { %159 = vperm.xlu0 %1833, %v34_v9  }
  0x2e   :  { %1834 = vset.pattern.permute.xlu1 %v1922_v3 }
  0x2f   :  { %585 = vperm.xlu1 %1834, %v32_v6   ;;  %v823_v6 = vld [vmem:[%s3267_s1 + $0x28] sm:$0xff] }
  0x30   :  { %1155 = vmatpush.msra.mxu3 %v823_v6 }
  0x31   :  { %1835 = vset.pattern.permute.xlu2 %v1921_v2 }
  0x32   :  { %60 = vperm.xlu2 %1835, %v33_v8  }
  0x34   :  { %1842 = vset.pattern.permute.xlu0 %v1922_v3 }
  0x35   :  { %591 = vperm.xlu0 %1842, %v34_v9  }
  0x37   :  { %1836 = vset.pattern.permute.xlu1 %v1920_v1 }
  0x38   :  { %300 = vperm.xlu1 %1836, %v33_v8  }
  0x3a   :  { %1837 = vset.pattern.permute.xlu2 %v1923_v5 }
  0x3b   :  { %444 = vperm.xlu2 %1837, %v33_v8  }
  0x3d   :  { %594 = vperm.xlu0 %1842, %v35_v10  }
  0x40   :  { %1838 = vset.pattern.permute.xlu1 %v1922_v3 }
  0x41   :  { %588 = vperm.xlu1 %1838, %v33_v8   ;;  %v820_v8 = vld [vmem:[%s3267_s1 + $0x10] sm:$0xff] }
  0x42   :  { %961 = vmatpush.msra.mxu0 %v820_v8 }
  0x43   :  { %1839 = vset.pattern.permute.xlu2 %v1921_v2 }
  0x44   :  { %63 = vperm.xlu2 %1839, %v34_v9   ;;  %962 = vmatpush.msra.mxu0 %v818_v12 }
  0x45   :  { %1849 = vset.pattern.permute.xlu0 %v1920_v1 }
  0x46   :  { %309 = vperm.xlu0 %1849, %v2013_v11  }
  0x49   :  { %1840 = vset.pattern.permute.xlu1 %v1920_v1 }
  0x4a   :  { %303 = vperm.xlu1 %1840, %v34_v9  }
  0x4c   :  { %1841 = vset.pattern.permute.xlu2 %v1923_v5 }
  0x4d   :  { %447 = vperm.xlu2 %1841, %v34_v9   ;;  %v852_v9 = vld [vmem:[%s3267_s1 + $0x110] sm:$0xff] }
  0x4e   :  { %312 = vperm.xlu0 %1849, %v2033_v15   ;;  %1026 = vmatpush.msra.mxu1 %v852_v9 }
  0x50   :  { %1027 = vmatpush.msra.mxu1 %v850_v13 }
  0x52   :  { %1843 = vset.pattern.permute.xlu1 %v1921_v2 }
  0x53   :  { %66 = vperm.xlu1 %1843, %v35_v10  }
  0x55   :  { %1844 = vset.pattern.permute.xlu2 %v1924_v7 }
  0x56   :  { %162 = vperm.xlu2 %1844, %v35_v10   ;;  %1856 = vset.pattern.permute.xlu0 %v1921_v2 }
  0x57   :  { %75 = vperm.xlu0 %1856, %v2137_v47  }
  0x5b   :  { %1845 = vset.pattern.permute.xlu1 %v1920_v1 }
  0x5c   :  { %306 = vperm.xlu1 %1845, %v35_v10  }
  0x5e   :  { %1846 = vset.pattern.permute.xlu2 %v1923_v5 }
  0x5f   :  { %450 = vperm.xlu2 %1846, %v35_v10   ;;  %v2074_v28 = vpop.permute.xlu2 %579  ;;  %v884_v10 = vld [vmem:[%s3267_s1 + $0x210] sm:$0xff]  ;;  %78 = vperm.xlu0 %1856, %v2229_v17  }
  0x60   :  { %1091 = vmatpush.msra.mxu2 %v884_v10 }
  0x62   :  { %1092 = vmatpush.msra.mxu2 %v882_v14 }
  0x64   :  { %1847 = vset.pattern.permute.xlu1 %v1921_v2 }
  0x65   :  { %69 = vperm.xlu1 %1847, %v2013_v11  }
  0x67   :  { %1848 = vset.pattern.permute.xlu2 %v1924_v7  ;;  %1863 = vset.pattern.permute.xlu0 %v1923_v5 }
  0x68   :  { %165 = vperm.xlu2 %1848, %v2013_v11   ;;  %v2132_v46 = vpop.permute.xlu2 %54  ;;  %462 = vperm.xlu0 %1863, %v2229_v17  }
  0x69   :  { %vm101_vm2 = vcmp.eq.s32.totalorder %v2242_v22, %v2132_v46  ;;  %vm103_vm4 = vcmp.eq.s32.totalorder %v2249_v25, %v2132_v46  ;;  %vm102_vm8 = vcmp.eq.s32.totalorder %v2255_v27, %v2132_v46 }
  0x6d   :  { %1850 = vset.pattern.permute.xlu1 %v1923_v5 }
  0x6e   :  { %453 = vperm.xlu1 %1850, %v2013_v11  }
  0x70   :  { %1851 = vset.pattern.permute.xlu2 %v1922_v3  ;;  %465 = vperm.xlu0 %1863, %v2284_v30  }
  0x71   :  { %597 = vperm.xlu2 %1851, %v2013_v11   ;;  %v2186_v62 = vpop.permute.xlu2 %294  ;;  %v821_v11 = vld [vmem:[%s3267_s1 + $0x18] sm:$0xff] }
  0x72   :  { %1156 = vmatpush.msra.mxu3 %v821_v11  ;;  %vm341_vm5 = vcmp.eq.s32.totalorder %v2242_v22, %v2186_v62  ;;  %vm342_vm11 = vcmp.eq.s32.totalorder %v2255_v27, %v2186_v62 }
  0x74   :  { %v2191_v0 = vpop.permute.xlu1 %291  ;;  %v2193_v4 = vpop.permute.xlu0 %51  ;;  %1157 = vmatpush.msra.mxu3 %v819_v16 }
  0x75   :  { %vm100_vm7 = vcmp.eq.s32.totalorder %v2249_v25, %v2193_v4  ;;  %vm98_vm10 = vcmp.eq.s32.totalorder %v2242_v22, %v2193_v4 }
  0x76   :  { %1852 = vset.pattern.permute.xlu1 %v1921_v2 }
  0x77   :  { %72 = vperm.xlu1 %1852, %v2033_v15  }
  0x78   :  { %1870 = vset.pattern.permute.xlu0 %v1924_v7 }
  0x79   :  { %1853 = vset.pattern.permute.xlu2 %v1924_v7  ;;  %180 = vperm.xlu0 %1870, %v2350_v40  }
  0x7a   :  { %168 = vperm.xlu2 %1853, %v2033_v15   ;;  %v2236_v20 = vpop.permute.xlu2 %57 }
  0x7d   :  { %v2231_v18 = vpop.permute.xlu1 %435  ;;  %v2233_v19 = vpop.permute.xlu0 %438 }
  0x7f   :  { %1854 = vset.pattern.permute.xlu1 %v1923_v5 }
  0x80   :  { %456 = vperm.xlu1 %1854, %v2033_v15  }
  0x81   :  { %183 = vperm.xlu0 %1870, %v2453_v53  }
  0x82   :  { %1855 = vset.pattern.permute.xlu2 %v1922_v3 }
  0x83   :  { %600 = vperm.xlu2 %1855, %v2033_v15   ;;  %v2252_v26 = vpop.permute.xlu2 %297 }
  0x85   :  { %v2244_v23 = vpop.permute.xlu0 %441 }
  0x86   :  { %v151_v24 = vpop.permute.xlu1 %150 }
  0x87   :  { %vm197_vm0 = vcmp.eq.s32.totalorder %v2242_v22, %v151_v24  ;;  %vm199_vm1 = vcmp.eq.s32.totalorder %v2249_v25, %v151_v24  ;;  %vm198_vm3 = vcmp.eq.s32.totalorder %v2255_v27, %v151_v24 }
  0x88   :  { %1857 = vset.pattern.permute.xlu1 %v1924_v7  ;;  %vm245_vm6 = vmor %vm101_vm2, %vm197_vm0  ;;  %vm343_vm2 = vcmp.eq.s32.totalorder %v2249_v25, %v2186_v62 }
  0x89   :  { %171 = vperm.xlu1 %1857, %v2137_v47   ;;  %vm2273_vm9 = vmor %vm103_vm4, %vm199_vm1  ;;  %vm338_vm1 = vcmp.eq.s32.totalorder %v2242_v22, %v2191_v0  ;;  %1877 = vset.pattern.permute.xlu0 %v1922_v3 }
  0x8a   :  { %vm246_vm12 = vmor %vm102_vm8, %vm198_vm3  ;;  %vm482_vm8 = vcmp.eq.s32.totalorder %v2242_v22, %v2231_v18  ;;  %615 = vperm.xlu0 %1877, %v2453_v53  }
  0x8b   :  { %1858 = vset.pattern.permute.xlu2 %v1920_v1  ;;  %vm2290_vm15 = vmor %vm245_vm6, %vm341_vm5  ;;  %vm99_vm5 = vcmp.eq.s32.totalorder %v2255_v27, %v2193_v4  ;;  %v2532_v4 = vld [vmem:[%s3266_s0 + $0x68] sm:$0xff] }
  0x8c   :  { %315 = vperm.xlu2 %1858, %v2137_v47   ;;  %vm2304_vm4 = vmor %vm246_vm12, %vm342_vm11  ;;  %v2316_v35 = vpop.permute.xlu2 %60  ;;  %vm626_vm11 = vcmp.eq.s32.totalorder %v2242_v22, %v2074_v28 }
  0x8e   :  { %v148_v29 = vpop.permute.xlu0 %147 }
  0x8f   :  { %vm194_vm13 = vcmp.eq.s32.totalorder %v2242_v22, %v148_v29  ;;  %vm196_vm14 = vcmp.eq.s32.totalorder %v2249_v25, %v148_v29  ;;  %v2288_v31 = vpop.permute.xlu1 %582  ;;  %vm195_vm6 = vcmp.eq.s32.totalorder %v2255_v27, %v148_v29 }
  0x90   :  { %vm2295_vm0 = vmor %vm100_vm7, %vm196_vm14  ;;  %vm485_vm14 = vcmp.eq.s32.totalorder %v2242_v22, %v2233_v19 }
  0x91   :  { %1859 = vset.pattern.permute.xlu1 %v1923_v5  ;;  %vm242_vm3 = vmor %vm98_vm10, %vm194_vm13  ;;  %vm339_vm13 = vcmp.eq.s32.totalorder %v2255_v27, %v2191_v0 }
  0x92   :  { %459 = vperm.xlu1 %1859, %v2137_v47   ;;  %vm386_vm7 = vmor %vm242_vm3, %vm338_vm1  ;;  %618 = vperm.xlu0 %1877, %v2532_v4  }
  0x93   :  { %vm530_vm10 = vmor %vm386_vm7, %vm482_vm8 }
  0x94   :  { %1860 = vset.pattern.permute.xlu2 %v1922_v3  ;;  %vm674_vm12 = vmor %vm530_vm10, %vm626_vm11  ;;  %vm486_vm11 = vcmp.eq.s32.totalorder %v2255_v27, %v2233_v19 }
  0x95   :  { %603 = vperm.xlu2 %1860, %v2137_v47   ;;  %vm2329_vm1 = vmor %vm2273_vm9, %vm343_vm2  ;;  %v1718_v38 = vsel %vm674_vm12, 1.0, %v1925_v37  ;;  %vm483_vm2 = vcmp.eq.s32.totalorder %v2255_v27, %v2231_v18  ;;  %vm628_vm12 = vcmp.eq.s32.totalorder %v2249_v25, %v2074_v28 }
  0x96   :  { %vm243_vm3 = vmor %vm99_vm5, %vm195_vm6  ;;  %963 = vmatmul.f32.vlgmr.msra.gmra.mxu0 %v1718_v38  ;;  %1158 = vmatmul.f32.vlgmr.msra.gmra.mxu3 %v1718_v38  ;;  %vm627_vm5 = vcmp.eq.s32.totalorder %v2255_v27, %v2074_v28  ;;  %v2384_v28 = vpop.permute.xlu2 %444  ;;  %v157_v51 = vpop.permute.xlu0 %156 }
  0x97   :  { %vm2341_vm7 = vmor %vm2290_vm15, %vm485_vm14  ;;  %vm340_vm15 = vcmp.eq.s32.totalorder %v2249_v25, %v2191_v0  ;;  %vm484_vm14 = vcmp.eq.s32.totalorder %v2249_v25, %v2231_v18 }
  0x98   :  { %vm387_vm9 = vmor %vm243_vm3, %vm339_vm13  ;;  %v154_v41 = vpop.permute.xlu1 %153  ;;  %vm3275_vm3 = vcmask 523264  }
  0x99   :  { %vm531_vm8 = vmor %vm387_vm9, %vm483_vm2  ;;  %vm202_vm9 = vcmp.eq.s32.totalorder %v2249_v25, %v154_v41 }
  0x9a   :  { %vm675_vm6 = vmor %vm531_vm8, %vm627_vm5  ;;  %1861 = vset.pattern.permute.xlu1 %v1924_v7  ;;  %vm106_vm8 = vcmp.eq.s32.totalorder %v2249_v25, %v2236_v20  ;;  %1884 = vset.pattern.permute.xlu0 %v1920_v1 }
  0x9b   :  { %v2361_v42 = vsel %vm675_vm6, 1.0, %v1925_v37  ;;  %vm388_vm10 = vmor %vm2295_vm0, %vm340_vm15  ;;  %174 = vperm.xlu1 %1861, %v2229_v17   ;;  %vm629_vm0 = vcmp.eq.s32.totalorder %v2242_v22, %v2288_v31  ;;  %vm630_vm15 = vcmp.eq.s32.totalorder %v2255_v27, %v2288_v31  ;;  %vm487_vm6 = vcmp.eq.s32.totalorder %v2249_v25, %v2233_v19 }
  0x9c   :  { %1028 = vmatmul.f32.vlgmr.msra.gmra.mxu1 %v2361_v42  ;;  %vm532_vm13 = vmor %vm388_vm10, %vm484_vm14 }
  0x9d   :  { %vm676_vm2 = vmor %vm532_vm13, %vm628_vm12  ;;  %1862 = vset.pattern.permute.xlu2 %v1920_v1  ;;  %vm200_vm13 = vcmp.eq.s32.totalorder %v2242_v22, %v154_v41 }
  0x9e   :  { %v2378_v43 = vsel %vm676_vm2, 1.0, %v1925_v37  ;;  %vm534_vm5 = vmor %vm2304_vm4, %vm486_vm11  ;;  %318 = vperm.xlu2 %1862, %v2229_v17   ;;  %vm631_vm4 = vcmp.eq.s32.totalorder %v2249_v25, %v2288_v31  ;;  %vm346_vm11 = vcmp.eq.s32.totalorder %v2249_v25, %v2252_v26  ;;  %vm344_vm2 = vcmp.eq.s32.totalorder %v2242_v22, %v2252_v26  ;;  %v2438_v50 = vpop.permute.xlu2 %63  ;;  %v160_v60 = vpop.permute.xlu0 %159  ;;  %v2629_v31 = vld [vmem:[%s3266_s0 + $0x78] sm:$0xff] }
  0x9f   :  { %1766 = vmatmul.msk.f32.vlgmr.msra.gmra.mxu2 %vm3275_vm3, %v2378_v43  ;;  %vm2391_vm14 = vmor %vm106_vm8, %vm202_vm9 }
  0xa0   :  { %vm677_vm10 = vmor %vm2341_vm7, %vm629_vm0  ;;  %vm104_vm0 = vcmp.eq.s32.totalorder %v2242_v22, %v2236_v20 }
  0xa1   :  { %v1721_v45 = vsel %vm677_vm10, 1.0, %v1925_v37  ;;  %vm678_vm12 = vmor %vm534_vm5, %vm630_vm15  ;;  %v586_v47 = vpop.permute.xlu1 %585 }
  0xa2   :  { %966 = vmatmul.f32.gmra.mxu0 %v1721_v45  ;;  %vm535_vm9 = vmor %vm2329_vm1, %vm487_vm6  ;;  %1161 = vmatmul.f32.gmra.mxu3 %v1721_v45  ;;  %v2409_v46 = vsel %vm678_vm12, 1.0, %v1925_v37  ;;  %vm488_vm1 = vcmp.eq.s32.totalorder %v2242_v22, %v2244_v23  ;;  %vm632_vm15 = vcmp.eq.s32.totalorder %v2242_v22, %v586_v47  ;;  %vm201_vm6 = vcmp.eq.s32.totalorder %v2255_v27, %v154_v41  ;;  %v879_v41 = vld [vmem:[%s3267_s1 + $0x1e8] sm:$0xff] }
  0xa3   :  { %vm679_vm7 = vmor %vm535_vm9, %vm631_vm4  ;;  %1864 = vset.pattern.permute.xlu1 %v1922_v3  ;;  %vm345_vm4 = vcmp.eq.s32.totalorder %v2255_v27, %v2252_v26 }
  0xa4   :  { %vm2415_vm8 = vmor %vm2391_vm14, %vm346_vm11  ;;  %1031 = vmatmul.f32.gmra.mxu1 %v2409_v46  ;;  %v2426_v49 = vsel %vm679_vm7, 1.0, %v1925_v37  ;;  %606 = vperm.xlu1 %1864, %v2229_v17   ;;  %vm105_vm11 = vcmp.eq.s32.totalorder %v2255_v27, %v2236_v20  ;;  %vm490_vm7 = vcmp.eq.s32.totalorder %v2249_v25, %v2244_v23  ;;  %v2581_v17 = vld [vmem:[%s3266_s0 + $0x70] sm:$0xff] }
  0xa5   :  { %vm248_vm5 = vmor %vm104_vm0, %vm200_vm13  ;;  %vm489_vm13 = vcmp.eq.s32.totalorder %v2255_v27, %v2244_v23  ;;  %333 = vperm.xlu0 %1884, %v2581_v17  }
  0xa6   :  { %vm392_vm14 = vmor %vm248_vm5, %vm344_vm2  ;;  %1865 = vset.pattern.permute.xlu2 %v1921_v2  ;;  %vm633_vm2 = vcmp.eq.s32.totalorder %v2255_v27, %v586_v47 }
  0xa7   :  { %1767 = vmatmul.msk.f32.gmra.mxu2 %vm3275_vm3, %v2426_v49  ;;  %vm536_vm10 = vmor %vm392_vm14, %vm488_vm1  ;;  %81 = vperm.xlu2 %1865, %v2284_v30   ;;  %vm634_vm1 = vcmp.eq.s32.totalorder %v2249_v25, %v586_v47  ;;  %v2493_v58 = vpop.permute.xlu2 %447  ;;  %v592_v6 = vpop.permute.xlu0 %591 }
  0xa8   :  { %vm680_vm12 = vmor %vm536_vm10, %vm632_vm15  ;;  %vm109_vm15 = vcmp.eq.s32.totalorder %v2249_v25, %v2316_v35 }
  0xa9   :  { %v1724_v52 = vsel %vm680_vm12, 1.0, %v1925_v37  ;;  %vm249_vm9 = vmor %vm105_vm11, %vm201_vm6  ;;  %vm205_vm6 = vcmp.eq.s32.totalorder %v2249_v25, %v157_v51  ;;  %vm107_vm11 = vcmp.eq.s32.totalorder %v2242_v22, %v2316_v35  ;;  %vm203_vm12 = vcmp.eq.s32.totalorder %v2242_v22, %v157_v51 }
  0xaa   :  { %969 = vmatmul.f32.gmra.mxu0 %v1724_v52  ;;  %vm393_vm0 = vmor %vm249_vm9, %vm345_vm4  ;;  %1164 = vmatmul.f32.gmra.mxu3 %v1724_v52  ;;  %v301_v54 = vpop.permute.xlu1 %300 }
  0xab   :  { %vm537_vm5 = vmor %vm393_vm0, %vm489_vm13  ;;  %vm349_vm10 = vcmp.eq.s32.totalorder %v2249_v25, %v301_v54  ;;  %vm108_vm0 = vcmp.eq.s32.totalorder %v2255_v27, %v2316_v35 }
  0xac   :  { %vm681_vm14 = vmor %vm537_vm5, %vm633_vm2  ;;  %1866 = vset.pattern.permute.xlu1 %v1924_v7  ;;  %vm347_vm2 = vcmp.eq.s32.totalorder %v2242_v22, %v301_v54 }
  0xad   :  { %v2461_v55 = vsel %vm681_vm14, 1.0, %v1925_v37  ;;  %vm538_vm4 = vmor %vm2415_vm8, %vm490_vm7  ;;  %177 = vperm.xlu1 %1866, %v2284_v30   ;;  %vm491_vm7 = vcmp.eq.s32.totalorder %v2242_v22, %v2384_v28  ;;  %336 = vperm.xlu0 %1884, %v2629_v31  }
  0xae   :  { %1034 = vmatmul.f32.gmra.mxu1 %v2461_v55  ;;  %vm682_vm13 = vmor %vm538_vm4, %vm634_vm1  ;;  %vm204_vm1 = vcmp.eq.s32.totalorder %v2255_v27, %v157_v51  ;;  %vm492_vm4 = vcmp.eq.s32.totalorder %v2255_v27, %v2384_v28  ;;  %v877_v51 = vld [vmem:[%s3267_s1 + $0x1d8] sm:$0xff] }
  0xaf   :  { %vm253_vm9 = vmor %vm109_vm15, %vm205_vm6  ;;  %v2472_v56 = vsel %vm682_vm13, 1.0, %v1925_v37  ;;  %1867 = vset.pattern.permute.xlu2 %v1920_v1  ;;  %vm348_vm15 = vcmp.eq.s32.totalorder %v2255_v27, %v301_v54  ;;  %v595_v18 = vpop.permute.xlu0 %594 }
  0xb0   :  { %1768 = vmatmul.msk.f32.gmra.mxu2 %vm3275_vm3, %v2472_v56  ;;  %vm2478_vm8 = vmor %vm253_vm9, %vm349_vm10  ;;  %321 = vperm.xlu2 %1867, %v2284_v30   ;;  %v163_v0 = vpop.permute.xlu2 %162 }
  0xb1   :  { %vm251_vm5 = vmor %vm107_vm11, %vm203_vm12  ;;  %vm493_vm11 = vcmp.eq.s32.totalorder %v2249_v25, %v2384_v28  ;;  %v897_v28 = vld [vmem:[%s3267_s1 + $0x278] sm:$0xff] }
  0xb2   :  { %vm395_vm6 = vmor %vm251_vm5, %vm347_vm2  ;;  %1280 = vmatpush.msrb.mxu0 %v897_v28  ;;  %v863_v28 = vld [vmem:[%s3267_s1 + $0x168] sm:$0xff] }
  0xb3   :  { %vm539_vm14 = vmor %vm395_vm6, %vm491_vm7  ;;  %v589_v59 = vpop.permute.xlu1 %588  ;;  %vm208_vm6 = vcmp.eq.s32.totalorder %v2249_v25, %v160_v60 }
  0xb4   :  { %vm252_vm10 = vmor %vm108_vm0, %vm204_vm1  ;;  %vm635_vm12 = vcmp.eq.s32.totalorder %v2242_v22, %v589_v59  ;;  %vm636_vm2 = vcmp.eq.s32.totalorder %v2255_v27, %v589_v59  ;;  %vm637_vm7 = vcmp.eq.s32.totalorder %v2249_v25, %v589_v59  ;;  %v859_v59 = vld [vmem:[%s3267_s1 + $0x148] sm:$0xff] }
  0xb5   :  { %vm396_vm13 = vmor %vm252_vm10, %vm348_vm15  ;;  %1868 = vset.pattern.permute.xlu1 %v1922_v3  ;;  %vm112_vm15 = vcmp.eq.s32.totalorder %v2249_v25, %v2438_v50  ;;  %vm206_vm10 = vcmp.eq.s32.totalorder %v2242_v22, %v160_v60  ;;  %1891 = vset.pattern.permute.xlu0 %v1921_v2 }
  0xb6   :  { %vm540_vm9 = vmor %vm396_vm13, %vm492_vm4  ;;  %609 = vperm.xlu1 %1868, %v2284_v30   ;;  %vm110_vm4 = vcmp.eq.s32.totalorder %v2242_v22, %v2438_v50  ;;  %vm207_vm13 = vcmp.eq.s32.totalorder %v2255_v27, %v160_v60 }
  0xb7   :  { %vm683_vm5 = vmor %vm539_vm14, %vm635_vm12 }
  0xb8   :  { %v1727_v61 = vsel %vm683_vm5, 1.0, %v1925_v37  ;;  %vm684_vm0 = vmor %vm540_vm9, %vm636_vm2  ;;  %1869 = vset.pattern.permute.xlu2 %v1921_v2  ;;  %v310_v29 = vpop.permute.xlu0 %309 }
  0xb9   :  { %972 = vmatmul.f32.gmra.mxu0 %v1727_v61  ;;  %v2508_v62 = vsel %vm684_vm0, 1.0, %v1925_v37  ;;  %vm541_vm1 = vmor %vm2478_vm8, %vm493_vm11  ;;  %1167 = vmatmul.f32.gmra.mxu3 %v1727_v61  ;;  %vm111_vm8 = vcmp.eq.s32.totalorder %v2255_v27, %v2438_v50  ;;  %v451_v11 = vpop.permute.xlu2 %450 }
  0xba   :  { %1037 = vmatmul.f32.gmra.mxu1 %v2508_v62  ;;  %vm685_vm14 = vmor %vm541_vm1, %vm637_vm7  ;;  %84 = vperm.xlu2 %1869, %v2350_v40   ;;  %vm494_vm7 = vcmp.eq.s32.totalorder %v2242_v22, %v2493_v58  ;;  %vm638_vm1 = vcmp.eq.s32.totalorder %v2242_v22, %v592_v6 }
  0xbb   :  { %v2521_v63 = vsel %vm685_vm14, 1.0, %v1925_v37  ;;  %vm256_vm11 = vmor %vm112_vm15, %vm208_vm6 }
  0xbc   :  { %1769 = vmatmul.msk.f32.gmra.mxu2 %vm3275_vm3, %v2521_v63  ;;  %v304_v8 = vpop.permute.xlu1 %303  ;;  %vm254_vm12 = vmor %vm110_vm4, %vm206_vm10  ;;  %vm495_vm4 = vcmp.eq.s32.totalorder %v2255_v27, %v2493_v58 }
  0xbd   :  { %vm350_vm9 = vcmp.eq.s32.totalorder %v2242_v22, %v304_v8  ;;  %vm352_vm2 = vcmp.eq.s32.totalorder %v2249_v25, %v304_v8  ;;  %vm255_vm5 = vmor %vm111_vm8, %vm207_vm13  ;;  %vm351_vm15 = vcmp.eq.s32.totalorder %v2255_v27, %v304_v8  ;;  %vm639_vm8 = vcmp.eq.s32.totalorder %v2255_v27, %v592_v6 }
  0xbe   :  { %vm2539_vm0 = vmor %vm256_vm11, %vm352_vm2  ;;  %1871 = vset.pattern.permute.xlu1 %v1920_v1  ;;  %vm496_vm13 = vcmp.eq.s32.totalorder %v2249_v25, %v2493_v58  ;;  %v895_v58 = vld [vmem:[%s3267_s1 + $0x268] sm:$0xff] }
  0xbf   :  { %324 = vperm.xlu1 %1871, %v2350_v40   ;;  %vm398_vm6 = vmor %vm254_vm12, %vm350_vm9  ;;  %vm640_vm12 = vcmp.eq.s32.totalorder %v2249_v25, %v592_v6  ;;  %1281 = vmatpush.msrb.mxu0 %v895_v58 }
  0xc0   :  { %vm542_vm14 = vmor %vm398_vm6, %vm494_vm7 }
  0xc1   :  { %vm686_vm10 = vmor %vm542_vm14, %vm638_vm1  ;;  %vm211_vm1 = vcmp.eq.s32.totalorder %v2249_v25, %v163_v0  ;;  %vm210_vm14 = vcmp.eq.s32.totalorder %v2255_v27, %v163_v0 }
  0xc2   :  { %1872 = vset.pattern.permute.xlu2 %v1923_v5  ;;  %v1730_v10 = vsel %vm686_vm10, 1.0, %v1925_v37  ;;  %vm399_vm11 = vmor %vm255_vm5, %vm351_vm15  ;;  %v166_v16 = vpop.permute.xlu2 %165 }
  0xc3   :  { %468 = vperm.xlu2 %1872, %v2350_v40   ;;  %975 = vmatmul.f32.gmra.mxu0 %v1730_v10  ;;  %vm543_vm9 = vmor %vm399_vm11, %vm495_vm4 }
  0xc4   :  { %1170 = vmatmul.f32.gmra.mxu3 %v1730_v10  ;;  %vm687_vm2 = vmor %vm543_vm9, %vm639_vm8 }
  0xc5   :  { %v2558_v12 = vsel %vm687_vm2, 1.0, %v1925_v37  ;;  %vm544_vm7 = vmor %vm2539_vm0, %vm496_vm13  ;;  %v67_v13 = vpop.permute.xlu1 %66  ;;  %vm209_vm0 = vcmp.eq.s32.totalorder %v2242_v22, %v163_v0 }
  0xc6   :  { %1040 = vmatmul.f32.gmra.mxu1 %v2558_v12  ;;  %vm688_vm5 = vmor %vm544_vm7, %vm640_vm12  ;;  %vm115_vm15 = vcmp.eq.s32.totalorder %v2249_v25, %v67_v13  ;;  %vm113_vm6 = vcmp.eq.s32.totalorder %v2242_v22, %v67_v13  ;;  %vm114_vm4 = vcmp.eq.s32.totalorder %v2255_v27, %v67_v13  ;;  %vm497_vm12 = vcmp.eq.s32.totalorder %v2242_v22, %v451_v11  ;;  %v893_v13 = vld [vmem:[%s3267_s1 + $0x258] sm:$0xff] }
  0xc7   :  { %v2564_v14 = vsel %vm688_vm5, 1.0, %v1925_v37  ;;  %1873 = vset.pattern.permute.xlu1 %v1922_v3  ;;  %vm259_vm10 = vmor %vm115_vm15, %vm211_vm1  ;;  %vm641_vm7 = vcmp.eq.s32.totalorder %v2242_v22, %v595_v18  ;;  %1282 = vmatpush.msrb.mxu0 %v893_v13 }
  0xc8   :  { %1770 = vmatmul.msk.f32.gmra.mxu2 %vm3275_vm3, %v2564_v14  ;;  %612 = vperm.xlu1 %1873, %v2350_v40   ;;  %vm257_vm8 = vmor %vm113_vm6, %vm209_vm0  ;;  %vm498_vm0 = vcmp.eq.s32.totalorder %v2255_v27, %v451_v11  ;;  %vm642_vm3 = vcmp.eq.s32.totalorder %v2255_v27, %v595_v18  ;;  %v313_v40 = vpop.permute.xlu0 %312 }
  0xc9   :  { %vm258_vm9 = vmor %vm114_vm4, %vm210_vm14  ;;  %vm499_vm14 = vcmp.eq.s32.totalorder %v2249_v25, %v451_v11  ;;  %v871_v11 = vld [vmem:[%s3267_s1 + $0x1a8] sm:$0xff] }
  0xcb   :  { %1874 = vset.pattern.permute.xlu2 %v1921_v2  ;;  %v598_v23 = vpop.permute.xlu2 %597 }
  0xcc   :  { %87 = vperm.xlu2 %1874, %v2453_v53  }
  0xce   :  { %v307_v19 = vpop.permute.xlu1 %306 }
  0xcf   :  { %vm353_vm13 = vcmp.eq.s32.totalorder %v2242_v22, %v307_v19  ;;  %vm355_vm11 = vcmp.eq.s32.totalorder %v2249_v25, %v307_v19  ;;  %vm354_vm5 = vcmp.eq.s32.totalorder %v2255_v27, %v307_v19 }
  0xd0   :  { %vm2587_vm2 = vmor %vm259_vm10, %vm355_vm11  ;;  %1875 = vset.pattern.permute.xlu1 %v1920_v1  ;;  %vm643_vm10 = vcmp.eq.s32.totalorder %v2249_v25, %v595_v18 }
  0xd1   :  { %327 = vperm.xlu1 %1875, %v2453_v53   ;;  %vm401_vm1 = vmor %vm257_vm8, %vm353_vm13 }
  0xd2   :  { %vm545_vm15 = vmor %vm401_vm1, %vm497_vm12  ;;  %vm213_vm1 = vcmp.eq.s32.totalorder %v2255_v27, %v166_v16 }
  0xd3   :  { %vm689_vm6 = vmor %vm545_vm15, %vm641_vm7 }
  0xd4   :  { %1876 = vset.pattern.permute.xlu2 %v1923_v5  ;;  %v1733_v21 = vsel %vm689_vm6, 1.0, %v1925_v37  ;;  %vm402_vm4 = vmor %vm258_vm9, %vm354_vm5  ;;  %vm214_vm9 = vcmp.eq.s32.totalorder %v2249_v25, %v166_v16  ;;  %vm212_vm5 = vcmp.eq.s32.totalorder %v2242_v22, %v166_v16  ;;  %vm358_vm6 = vcmp.eq.s32.totalorder %v2249_v25, %v310_v29  ;;  %v169_v30 = vpop.permute.xlu2 %168 }
  0xd5   :  { %471 = vperm.xlu2 %1876, %v2453_v53   ;;  %978 = vmatmul.f32.gmra.mxu0 %v1733_v21  ;;  %vm546_vm8 = vmor %vm402_vm4, %vm498_vm0  ;;  %v76_v53 = vpop.permute.xlu0 %75 }
  0xd6   :  { %1173 = vmatmul.f32.gmra.mxu3 %v1733_v21  ;;  %vm690_vm13 = vmor %vm546_vm8, %vm642_vm3  ;;  %vm3298_vm3 = vcmask 523264  }
  0xd7   :  { %v2603_v24 = vsel %vm690_vm13, 1.0, %v1925_v37  ;;  %vm547_vm11 = vmor %vm2587_vm2, %vm499_vm14  ;;  %v70_v26 = vpop.permute.xlu1 %69  ;;  %vm356_vm14 = vcmp.eq.s32.totalorder %v2242_v22, %v310_v29 }
  0xd8   :  { %1043 = vmatmul.f32.gmra.mxu1 %v2603_v24  ;;  %vm691_vm12 = vmor %vm547_vm11, %vm643_vm10  ;;  %vm118_vm7 = vcmp.eq.s32.totalorder %v2249_v25, %v70_v26  ;;  %vm116_vm2 = vcmp.eq.s32.totalorder %v2242_v22, %v70_v26  ;;  %vm117_vm15 = vcmp.eq.s32.totalorder %v2255_v27, %v70_v26  ;;  %vm357_vm10 = vcmp.eq.s32.totalorder %v2255_v27, %v310_v29  ;;  %v867_v29 = vld [vmem:[%s3267_s1 + $0x188] sm:$0xff] }
  0xd9   :  { %v2609_v15 = vsel %vm691_vm12, 1.0, %v1925_v37  ;;  %1878 = vset.pattern.permute.xlu1 %v1921_v2  ;;  %vm262_vm0 = vmor %vm118_vm7, %vm214_vm9  ;;  %vm644_vm12 = vcmp.eq.s32.totalorder %v2242_v22, %v598_v23 }
  0xda   :  { %1771 = vmatmul.msk.f32.gmra.mxu2 %vm3298_vm3, %v2609_v15  ;;  %90 = vperm.xlu1 %1878, %v2532_v4   ;;  %vm260_vm4 = vmor %vm116_vm2, %vm212_vm5  ;;  %vm645_vm2 = vcmp.eq.s32.totalorder %v2255_v27, %v598_v23 }
  0xdb   :  { %vm261_vm8 = vmor %vm117_vm15, %vm213_vm1 }
  0xdc   :  { %vm2631_vm13 = vmor %vm262_vm0, %vm358_vm6  ;;  %vm646_vm0 = vcmp.eq.s32.totalorder %v2249_v25, %v598_v23 }
  0xdd   :  { %1879 = vset.pattern.permute.xlu2 %v1924_v7  ;;  %vm404_vm11 = vmor %vm260_vm4, %vm356_vm14  ;;  %v601_v36 = vpop.permute.xlu2 %600 }
  0xde   :  { %186 = vperm.xlu2 %1879, %v2532_v4   ;;  %vm405_vm7 = vmor %vm261_vm8, %vm357_vm10  ;;  %vm3301_vm8 = vcmask 523264  }
  0xe0   :  { %v454_v33 = vpop.permute.xlu1 %453 }
  0xe1   :  { %vm500_vm9 = vcmp.eq.s32.totalorder %v2242_v22, %v454_v33  ;;  %vm501_vm3 = vcmp.eq.s32.totalorder %v2255_v27, %v454_v33  ;;  %vm502_vm1 = vcmp.eq.s32.totalorder %v2249_v25, %v454_v33 }
  0xe2   :  { %1880 = vset.pattern.permute.xlu1 %v1920_v1  ;;  %vm548_vm5 = vmor %vm404_vm11, %vm500_vm9  ;;  %v881_v1 = vld [vmem:[%s3267_s1 + $0x1f8] sm:$0xff] }
  0xe3   :  { %330 = vperm.xlu1 %1880, %v2532_v4   ;;  %vm692_vm15 = vmor %vm548_vm5, %vm644_vm12  ;;  %1207 = vmatpush.msrb.mxu2 %v881_v1  ;;  %vm215_vm12 = vcmp.eq.s32.totalorder %v2242_v22, %v169_v30  ;;  %v865_v1 = vld [vmem:[%s3267_s1 + $0x178] sm:$0xff] }
  0xe4   :  { %v1736_v34 = vsel %vm692_vm15, 1.0, %v1925_v37  ;;  %vm549_vm6 = vmor %vm405_vm7, %vm501_vm3  ;;  %vm216_vm7 = vcmp.eq.s32.totalorder %v2255_v27, %v169_v30 }
  0xe5   :  { %981 = vmatmul.f32.gmra.mxu0 %v1736_v34  ;;  %vm693_vm14 = vmor %vm549_vm6, %vm645_vm2  ;;  %1176 = vmatmul.f32.gmra.mxu3 %v1736_v34  ;;  %vm361_vm2 = vcmp.eq.s32.totalorder %v2249_v25, %v313_v40 }
  0xe6   :  { %v2649_v35 = vsel %vm693_vm14, 1.0, %v1925_v37  ;;  %vm550_vm4 = vmor %vm2631_vm13, %vm502_vm1  ;;  %1881 = vset.pattern.permute.xlu2 %v1923_v5  ;;  %vm217_vm13 = vcmp.eq.s32.totalorder %v2249_v25, %v169_v30  ;;  %vm359_vm1 = vcmp.eq.s32.totalorder %v2242_v22, %v313_v40  ;;  %v2680_v44 = vpop.permute.xlu2 %315  ;;  %1208 = vmatpush.msrb.mxu2 %v879_v41  ;;  %v891_v30 = vld [vmem:[%s3267_s1 + $0x248] sm:$0xff] }
  0xe7   :  { %1046 = vmatmul.f32.gmra.mxu1 %v2649_v35  ;;  %vm694_vm10 = vmor %vm550_vm4, %vm646_vm0  ;;  %474 = vperm.xlu2 %1881, %v2532_v4   ;;  %vm360_vm0 = vcmp.eq.s32.totalorder %v2255_v27, %v313_v40 }
  0xe8   :  { %v2657_v38 = vsel %vm694_vm10, 1.0, %v1925_v37  ;;  %vm647_vm10 = vcmp.eq.s32.totalorder %v2242_v22, %v601_v36  ;;  %1209 = vmatpush.msrb.mxu2 %v877_v51  ;;  %1283 = vmatpush.msrb.mxu0 %v891_v30 }
  0xe9   :  { %1772 = vmatmul.msk.f32.gmra.mxu2 %vm3301_vm8, %v2657_v38  ;;  %v73_v39 = vpop.permute.xlu1 %72 }
  0xea   :  { %vm121_vm11 = vcmp.eq.s32.totalorder %v2249_v25, %v73_v39  ;;  %vm119_vm9 = vcmp.eq.s32.totalorder %v2242_v22, %v73_v39  ;;  %vm120_vm3 = vcmp.eq.s32.totalorder %v2255_v27, %v73_v39 }
  0xeb   :  { %1882 = vset.pattern.permute.xlu1 %v1921_v2  ;;  %vm265_vm5 = vmor %vm121_vm11, %vm217_vm13 }
  0xec   :  { %93 = vperm.xlu1 %1882, %v2581_v17   ;;  %vm263_vm15 = vmor %vm119_vm9, %vm215_vm12  ;;  %vm648_vm9 = vcmp.eq.s32.totalorder %v2255_v27, %v601_v36 }
  0xed   :  { %vm264_vm6 = vmor %vm120_vm3, %vm216_vm7 }
  0xee   :  { %vm2683_vm14 = vmor %vm265_vm5, %vm361_vm2  ;;  %vm649_vm5 = vcmp.eq.s32.totalorder %v2249_v25, %v601_v36 }
  0xef   :  { %1883 = vset.pattern.permute.xlu2 %v1924_v7  ;;  %vm407_vm4 = vmor %vm263_vm15, %vm359_vm1  ;;  %v604_v54 = vpop.permute.xlu2 %603 }
  0xf0   :  { %189 = vperm.xlu2 %1883, %v2581_v17   ;;  %vm408_vm13 = vmor %vm264_vm6, %vm360_vm0  ;;  %vm3304_vm6 = vcmask 523264  }
  0xf2   :  { %v457_v47 = vpop.permute.xlu1 %456 }
  0xf3   :  { %vm503_vm8 = vcmp.eq.s32.totalorder %v2242_v22, %v457_v47  ;;  %vm504_vm11 = vcmp.eq.s32.totalorder %v2255_v27, %v457_v47  ;;  %vm505_vm7 = vcmp.eq.s32.totalorder %v2249_v25, %v457_v47 }
  0xf4   :  { %1885 = vset.pattern.permute.xlu1 %v1923_v5  ;;  %vm551_vm12 = vmor %vm407_vm4, %vm503_vm8  ;;  %vm124_vm4 = vcmp.eq.s32.totalorder %v2249_v25, %v76_v53  ;;  %vm122_vm8 = vcmp.eq.s32.totalorder %v2242_v22, %v76_v53 }
  0xf5   :  { %477 = vperm.xlu1 %1885, %v2581_v17   ;;  %vm695_vm3 = vmor %vm551_vm12, %vm647_vm10 }
  0xf6   :  { %v1739_v48 = vsel %vm695_vm3, 1.0, %v1925_v37  ;;  %vm552_vm2 = vmor %vm408_vm13, %vm504_vm11  ;;  %vm123_vm11 = vcmp.eq.s32.totalorder %v2255_v27, %v76_v53 }
  0xf7   :  { %984 = vmatmul.f32.gmra.mxu0 %v1739_v48  ;;  %vm696_vm1 = vmor %vm552_vm2, %vm648_vm9  ;;  %1179 = vmatmul.f32.gmra.mxu3 %v1739_v48  ;;  %vm364_vm9 = vcmp.eq.s32.totalorder %v2249_v25, %v2680_v44  ;;  %v861_v48 = vld [vmem:[%s3267_s1 + $0x158] sm:$0xff] }
  0xf8   :  { %v2697_v50 = vsel %vm696_vm1, 1.0, %v1925_v37  ;;  %vm553_vm15 = vmor %vm2683_vm14, %vm505_vm7  ;;  %1886 = vset.pattern.permute.xlu2 %v1922_v3  ;;  %vm362_vm7 = vcmp.eq.s32.totalorder %v2242_v22, %v2680_v44  ;;  %v319_v61 = vpop.permute.xlu2 %318 }
  0xf9   :  { %1049 = vmatmul.f32.gmra.mxu1 %v2697_v50  ;;  %vm697_vm0 = vmor %vm553_vm15, %vm649_vm5  ;;  %621 = vperm.xlu2 %1886, %v2581_v17   ;;  %vm363_vm5 = vcmp.eq.s32.totalorder %v2255_v27, %v2680_v44  ;;  %v869_v17 = vld [vmem:[%s3267_s1 + $0x198] sm:$0xff] }
  0xfa   :  { %v2708_v52 = vsel %vm697_vm0, 1.0, %v1925_v37  ;;  %vm650_vm0 = vcmp.eq.s32.totalorder %v2242_v22, %v604_v54  ;;  %v889_v44 = vld [vmem:[%s3267_s1 + $0x238] sm:$0xff] }
  0xfb   :  { %1773 = vmatmul.msk.f32.gmra.mxu2 %vm3304_vm6, %v2708_v52  ;;  %v172_v57 = vpop.permute.xlu1 %171  ;;  %1284 = vmatpush.msrb.mxu0 %v889_v44  ;;  %v1344_v44 = vld [vmem:[%s3268_s2 + $0x38] sm:$0xff] }
  0xfc   :  { %vm220_vm14 = vcmp.eq.s32.totalorder %v2249_v25, %v172_v57  ;;  %vm218_vm10 = vcmp.eq.s32.totalorder %v2242_v22, %v172_v57  ;;  %vm219_vm13 = vcmp.eq.s32.totalorder %v2255_v27, %v172_v57 }
  0xfd   :  { %1887 = vset.pattern.permute.xlu1 %v1921_v2  ;;  %vm268_vm12 = vmor %vm124_vm4, %vm220_vm14  ;;  %v875_v2 = vld [vmem:[%s3267_s1 + $0x1c8] sm:$0xff] }
  0xfe   :  { %96 = vperm.xlu1 %1887, %v2629_v31   ;;  %vm266_vm3 = vmor %vm122_vm8, %vm218_vm10  ;;  %1210 = vmatpush.msrb.mxu2 %v875_v2  ;;  %vm651_vm8 = vcmp.eq.s32.totalorder %v2255_v27, %v604_v54 }
  0xff   :  { %vm267_vm2 = vmor %vm123_vm11, %vm219_vm13 }
 0x100   :  { %vm2734_vm1 = vmor %vm268_vm12, %vm364_vm9  ;;  %vm652_vm12 = vcmp.eq.s32.totalorder %v2249_v25, %v604_v54 }
 0x101   :  { %1888 = vset.pattern.permute.xlu2 %v1924_v7  ;;  %v79_v7 = vpop.permute.xlu0 %78  ;;  %vm410_vm15 = vmor %vm266_vm3, %vm362_vm7  ;;  %v82_v9 = vpop.permute.xlu2 %81 }
 0x102   :  { %192 = vperm.xlu2 %1888, %v2629_v31   ;;  %vm411_vm14 = vmor %vm267_vm2, %vm363_vm5  ;;  %vm127_vm2 = vcmp.eq.s32.totalorder %v2249_v25, %v79_v7 }
 0x104   :  { %v460_v60 = vpop.permute.xlu1 %459 }
 0x105   :  { %vm506_vm6 = vcmp.eq.s32.totalorder %v2242_v22, %v460_v60  ;;  %vm507_vm4 = vcmp.eq.s32.totalorder %v2255_v27, %v460_v60  ;;  %vm508_vm13 = vcmp.eq.s32.totalorder %v2249_v25, %v460_v60 }
 0x106   :  { %1889 = vset.pattern.permute.xlu1 %v1923_v5  ;;  %vm554_vm10 = vmor %vm410_vm15, %vm506_vm6  ;;  %v873_v5 = vld [vmem:[%s3267_s1 + $0x1b8] sm:$0xff]  ;;  %vm3307_vm15 = vcmask 523264  }
 0x107   :  { %480 = vperm.xlu1 %1889, %v2629_v31   ;;  %vm698_vm11 = vmor %vm554_vm10, %vm650_vm0  ;;  %1211 = vmatpush.msrb.mxu2 %v873_v5  ;;  %vm125_vm0 = vcmp.eq.s32.totalorder %v2242_v22, %v79_v7  ;;  %vm365_vm10 = vcmp.eq.s32.totalorder %v2242_v22, %v319_v61 }
 0x108   :  { %v1742_v0 = vsel %vm698_vm11, 1.0, %v1925_v37  ;;  %vm555_vm9 = vmor %vm411_vm14, %vm507_vm4  ;;  %vm126_vm11 = vcmp.eq.s32.totalorder %v2255_v27, %v79_v7  ;;  %v887_v7 = vld [vmem:[%s3267_s1 + $0x228] sm:$0xff] }
 0x109   :  { %987 = vmatmul.f32.gmra.mxu0 %v1742_v0  ;;  %vm699_vm7 = vmor %vm555_vm9, %vm651_vm8  ;;  %1182 = vmatmul.f32.gmra.mxu3 %v1742_v0  ;;  %v1340_v0 = vld [vmem:[%s3268_s2 + $0x18] sm:$0xff] }
 0x10a   :  { %v2748_v4 = vsel %vm699_vm7, 1.0, %v1925_v37  ;;  %vm556_vm3 = vmor %vm2734_vm1, %vm508_vm13  ;;  %1890 = vset.pattern.permute.xlu2 %v1922_v3  ;;  %vm367_vm1 = vcmp.eq.s32.totalorder %v2249_v25, %v319_v61  ;;  %v463_v3 = vpop.permute.xlu0 %462  ;;  %vm366_vm7 = vcmp.eq.s32.totalorder %v2255_v27, %v319_v61  ;;  %1212 = vmatpush.msrb.mxu2 %v871_v11  ;;  %v322_v18 = vpop.permute.xlu2 %321 }
 0x10b   :  { %1052 = vmatmul.f32.gmra.mxu1 %v2748_v4  ;;  %vm700_vm5 = vmor %vm556_vm3, %vm652_vm12  ;;  %624 = vperm.xlu2 %1890, %v2629_v31   ;;  %vm509_vm13 = vcmp.eq.s32.totalorder %v2242_v22, %v463_v3  ;;  %v3311_v31 = vmov 0 }
 0x10c   :  { %v2760_v6 = vsel %vm700_vm5, 1.0, %v1925_v37  ;;  %1213 = vmatpush.msrb.mxu2 %v869_v17  ;;  %1285 = vmatpush.msrb.mxu0 %v887_v7  ;;  %v1350_v17 = vld [vmem:[%s3268_s2 + $0x68] sm:$0xff]  ;;  %v1341_v7 = vld [vmem:[%s3268_s2 + $0x20] sm:$0xff] }
 0x10d   :  { %1774 = vmatmul.msk.f32.gmra.mxu2 %vm3307_vm15, %v2760_v6  ;;  %v175_v8 = vpop.permute.xlu1 %174  ;;  %vm511_vm15 = vcmp.eq.s32.totalorder %v2249_v25, %v463_v3 }
 0x10e   :  { %vm221_vm6 = vcmp.eq.s32.totalorder %v2242_v22, %v175_v8  ;;  %vm223_vm14 = vcmp.eq.s32.totalorder %v2249_v25, %v175_v8  ;;  %vm222_vm12 = vcmp.eq.s32.totalorder %v2255_v27, %v175_v8  ;;  %1214 = vmatpush.msrb.mxu2 %v867_v29  ;;  %v857_v8 = vld [vmem:[%s3267_s1 + $0x138] sm:$0xff] }
 0x10f   :  { %vm271_vm4 = vmor %vm127_vm2, %vm223_vm14  ;;  %vm510_vm2 = vcmp.eq.s32.totalorder %v2255_v27, %v463_v3  ;;  %v1352_v3 = vld [vmem:[%s3268_s2 + $0x78] sm:$0xff] }
 0x110   :  { %vm2769_vm8 = vmor %vm271_vm4, %vm367_vm1  ;;  %1215 = vmatpush.msrb.mxu2 %v865_v1  ;;  %1410 = vmatpush.msrb.mxu1 %v1352_v3  ;;  %v1348_v29 = vld [vmem:[%s3268_s2 + $0x58] sm:$0xff] }
 0x111   :  { %vm269_vm9 = vmor %vm125_vm0, %vm221_vm6 }
 0x112   :  { %vm413_vm3 = vmor %vm269_vm9, %vm365_vm10  ;;  %v466_v26 = vpop.permute.xlu0 %465  ;;  %1216 = vmatpush.msrb.mxu2 %v863_v28  ;;  %v853_v28 = vld [vmem:[%s3267_s1 + $0x118] sm:$0xff] }
 0x113   :  { %vm557_vm5 = vmor %vm413_vm3, %vm509_vm13  ;;  %vm130_vm3 = vcmp.eq.s32.totalorder %v2249_v25, %v82_v9 }
 0x114   :  { %vm270_vm1 = vmor %vm126_vm11, %vm222_vm12  ;;  %v85_v32 = vpop.permute.xlu2 %84  ;;  %1217 = vmatpush.msrb.mxu2 %v861_v48  ;;  %v1343_v48 = vld [vmem:[%s3268_s2 + $0x30] sm:$0xff] }
 0x115   :  { %vm414_vm0 = vmor %vm270_vm1, %vm366_vm7  ;;  %vm3310_vm7 = vcmask 523264   ;;  %vm368_vm1 = vcmp.eq.s32.totalorder %v2242_v22, %v322_v18 }
 0x116   :  { %v607_v16 = vpop.permute.xlu1 %606  ;;  %vm558_vm6 = vmor %vm414_vm0, %vm510_vm2  ;;  %vm128_vm0 = vcmp.eq.s32.totalorder %v2242_v22, %v82_v9  ;;  %1218 = vmatpush.msrb.mxu2 %v859_v59 }
 0x117   :  { %vm655_vm14 = vcmp.eq.s32.totalorder %v2249_v25, %v607_v16  ;;  %vm653_vm4 = vcmp.eq.s32.totalorder %v2242_v22, %v607_v16  ;;  %vm654_vm10 = vcmp.eq.s32.totalorder %v2255_v27, %v607_v16  ;;  %vm559_vm13 = vmor %vm2769_vm8, %vm511_vm15  ;;  %vm370_vm8 = vcmp.eq.s32.totalorder %v2249_v25, %v322_v18  ;;  %v1351_v16 = vld [vmem:[%s3268_s2 + $0x70] sm:$0xff] }
 0x118   :  { %vm701_vm9 = vmor %vm557_vm5, %vm653_vm4  ;;  %1219 = vmatpush.msrb.mxu2 %v857_v8  ;;  %1411 = vmatpush.msrb.mxu1 %v1351_v16  ;;  %v1339_v8 = vld [vmem:[%s3268_s2 + $0x10] sm:$0xff] }
 0x119   :  { %v1745_v19 = vsel %vm701_vm9, 1.0, %v1925_v37  ;;  %vm702_vm11 = vmor %vm558_vm6, %vm654_vm10 }
 0x11a   :  { %990 = vmatmul.f32.gmra.mxu0 %v1745_v19  ;;  %v2795_v20 = vsel %vm702_vm11, 1.0, %v1925_v37  ;;  %vm703_vm12 = vmor %vm559_vm13, %vm655_vm14  ;;  %1185 = vmatmul.f32.gmra.mxu3 %v1745_v19  ;;  %vm512_vm14 = vcmp.eq.s32.totalorder %v2242_v22, %v466_v26  ;;  %vm369_vm13 = vcmp.eq.s32.totalorder %v2255_v27, %v322_v18  ;;  %vm129_vm11 = vcmp.eq.s32.totalorder %v2255_v27, %v82_v9  ;;  %v181_v40 = vpop.permute.xlu0 %180  ;;  %v1349_v19 = vld [vmem:[%s3268_s2 + $0x60] sm:$0xff] }
 0x11b   :  { %1055 = vmatmul.f32.gmra.mxu1 %v2795_v20  ;;  %v2799_v21 = vsel %vm703_vm12, 1.0, %v1925_v37 }
 0x11c   :  { %1775 = vmatmul.msk.f32.gmra.mxu2 %vm3310_vm7, %v2799_v21  ;;  %vm513_vm7 = vcmp.eq.s32.totalorder %v2255_v27, %v466_v26  ;;  %1412 = vmatpush.msrb.mxu1 %v1350_v17 }
 0x11d   :  { %v469_v39 = vpop.permute.xlu2 %468 }
 0x11e   :  { %1413 = vmatpush.msrb.mxu1 %v1349_v19 }
 0x11f   :  { %v178_v23 = vpop.permute.xlu1 %177 }
 0x120   :  { %vm224_vm5 = vcmp.eq.s32.totalorder %v2242_v22, %v178_v23  ;;  %vm226_vm2 = vcmp.eq.s32.totalorder %v2249_v25, %v178_v23  ;;  %vm225_vm4 = vcmp.eq.s32.totalorder %v2255_v27, %v178_v23  ;;  %v855_v23 = vld [vmem:[%s3267_s1 + $0x128] sm:$0xff]  ;;  %1414 = vmatpush.msrb.mxu1 %v1348_v29 }
 0x121   :  { %vm274_vm15 = vmor %vm130_vm3, %vm226_vm2  ;;  %vm514_vm3 = vcmp.eq.s32.totalorder %v2249_v25, %v466_v26  ;;  %1220 = vmatpush.msrb.mxu2 %v855_v23  ;;  %v885_v26 = vld [vmem:[%s3267_s1 + $0x218] sm:$0xff] }
 0x122   :  { %vm2815_vm6 = vmor %vm274_vm15, %vm370_vm8  ;;  %v184_v53 = vpop.permute.xlu0 %183  ;;  %1286 = vmatpush.msrb.mxu0 %v885_v26 }
 0x123   :  { %v3312_v31 = vsel %vm2815_vm6, 4294967295, %v3311_v31  ;;  %vm272_vm10 = vmor %vm128_vm0, %vm224_vm5  ;;  %1221 = vmatpush.msrb.mxu2 %v853_v28 }
 0x124   :  { %vm416_vm9 = vmor %vm272_vm10, %vm368_vm1  ;;  %vm3313_vm1 = vnez %v3312_v31  ;;  %v1347_v31 = vld [vmem:[%s3268_s2 + $0x50] sm:$0xff] }
 0x125   :  { %vm560_vm12 = vmor %vm416_vm9, %vm512_vm14  ;;  %1415 = vmatpush.msrb.mxu1 %v1347_v31 }
 0x126   :  { %vm273_vm8 = vmor %vm129_vm11, %vm225_vm4  ;;  %vm229_vm11 = vcmp.eq.s32.totalorder %v2249_v25, %v181_v40  ;;  %v88_v47 = vpop.permute.xlu2 %87 }
 0x127   :  { %vm417_vm2 = vmor %vm273_vm8, %vm369_vm13  ;;  %vm3314_vm13 = vcmask 523264   ;;  %vm228_vm8 = vcmp.eq.s32.totalorder %v2255_v27, %v181_v40 }
 0x128   :  { %v610_v33 = vpop.permute.xlu1 %609  ;;  %vm561_vm15 = vmor %vm417_vm2, %vm513_vm7  ;;  %vm227_vm7 = vcmp.eq.s32.totalorder %v2242_v22, %v181_v40  ;;  %v1345_v40 = vld [vmem:[%s3268_s2 + $0x40] sm:$0xff] }
 0x129   :  { %vm658_vm6 = vcmp.eq.s32.totalorder %v2249_v25, %v610_v33  ;;  %vm656_vm0 = vcmp.eq.s32.totalorder %v2242_v22, %v610_v33  ;;  %vm657_vm5 = vcmp.eq.s32.totalorder %v2255_v27, %v610_v33  ;;  %vm562_vm10 = vmor %vm3313_vm1, %vm514_vm3  ;;  %vm132_vm3 = vcmp.eq.s32.totalorder %v2255_v27, %v85_v32 }
 0x12a   :  { %vm704_vm9 = vmor %vm560_vm12, %vm656_vm0  ;;  %vm131_vm12 = vcmp.eq.s32.totalorder %v2242_v22, %v85_v32  ;;  %v616_v60 = vpop.permute.xlu0 %615 }
 0x12b   :  { %v1748_v34 = vsel %vm704_vm9, 1.0, %v1925_v37  ;;  %vm705_vm14 = vmor %vm561_vm15, %vm657_vm5 }
 0x12c   :  { %993 = vmatmul.f32.gmra.mxu0 %v1748_v34  ;;  %v2835_v36 = vsel %vm705_vm14, 1.0, %v1925_v37  ;;  %vm706_vm4 = vmor %vm562_vm10, %vm658_vm6  ;;  %1188 = vmatmul.f32.gmra.mxu3 %v1748_v34  ;;  %vm133_vm6 = vcmp.eq.s32.totalorder %v2249_v25, %v85_v32  ;;  %vm515_vm14 = vcmp.eq.s32.totalorder %v2242_v22, %v469_v39  ;;  %v1346_v34 = vld [vmem:[%s3268_s2 + $0x48] sm:$0xff] }
 0x12d   :  { %1058 = vmatmul.f32.gmra.mxu1 %v2835_v36  ;;  %v2839_v41 = vsel %vm706_vm4, 1.0, %v1925_v37  ;;  %vm277_vm2 = vmor %vm133_vm6, %vm229_vm11  ;;  %vm517_vm11 = vcmp.eq.s32.totalorder %v2249_v25, %v469_v39 }
 0x12e   :  { %1776 = vmatmul.msk.f32.gmra.mxu2 %vm3314_vm13, %v2839_v41  ;;  %vm275_vm5 = vmor %vm131_vm12, %vm227_vm7  ;;  %vm516_vm13 = vcmp.eq.s32.totalorder %v2255_v27, %v469_v39  ;;  %1416 = vmatpush.msrb.mxu1 %v1346_v34  ;;  %v1029_v34 = vpop.f32.mrf.mxu1  ;;  %v1094_v39 = vpop.f32.mrf.mxu2 }
 0x12f   :  { %vm276_vm10 = vmor %vm132_vm3, %vm228_vm8  ;;  %v472_v58 = vpop.permute.xlu2 %471 }
 0x130   :  { %1417 = vmatpush.msrb.mxu1 %v1345_v40 }
 0x131   :  { %v325_v45 = vpop.permute.xlu1 %324 }
 0x132   :  { %vm371_vm15 = vcmp.eq.s32.totalorder %v2242_v22, %v325_v45  ;;  %vm372_vm0 = vcmp.eq.s32.totalorder %v2255_v27, %v325_v45  ;;  %vm373_vm1 = vcmp.eq.s32.totalorder %v2249_v25, %v325_v45  ;;  %v619_v32 = vpop.permute.xlu0 %618  ;;  %1418 = vmatpush.msrb.mxu1 %v1344_v44 }
 0x133   :  { %vm419_vm9 = vmor %vm275_vm5, %vm371_vm15 }
 0x134   :  { %vm420_vm4 = vmor %vm276_vm10, %vm372_vm0  ;;  %1419 = vmatpush.msrb.mxu1 %v1343_v48 }
 0x135   :  { %vm421_vm6 = vmor %vm277_vm2, %vm373_vm1  ;;  %vm136_vm1 = vcmp.eq.s32.totalorder %v2249_v25, %v88_v47 }
 0x136   :  { %vm563_vm7 = vmor %vm419_vm9, %vm515_vm14  ;;  %vm232_vm9 = vcmp.eq.s32.totalorder %v2249_v25, %v184_v53  ;;  %vm134_vm14 = vcmp.eq.s32.totalorder %v2242_v22, %v88_v47  ;;  %v1032_v44 = vpop.f32.mrf.mxu1 }
 0x137   :  { %vm564_vm12 = vmor %vm420_vm4, %vm516_vm13  ;;  %vm230_vm4 = vcmp.eq.s32.totalorder %v2242_v22, %v184_v53  ;;  %vm3315_vm13 = vcmask 523264  }
 0x138   :  { %vm565_vm0 = vmor %vm421_vm6, %vm517_vm11  ;;  %vm135_vm6 = vcmp.eq.s32.totalorder %v2255_v27, %v88_v47  ;;  %vm231_vm11 = vcmp.eq.s32.totalorder %v2255_v27, %v184_v53  ;;  %v187_v10 = vpop.permute.xlu2 %186 }
 0x13a   :  { %v613_v51 = vpop.permute.xlu1 %612  ;;  %v334_v59 = vpop.permute.xlu0 %333 }
 0x13b   :  { %vm661_vm3 = vcmp.eq.s32.totalorder %v2249_v25, %v613_v51  ;;  %vm659_vm8 = vcmp.eq.s32.totalorder %v2242_v22, %v613_v51  ;;  %vm660_vm15 = vcmp.eq.s32.totalorder %v2255_v27, %v613_v51 }
 0x13c   :  { %vm707_vm5 = vmor %vm563_vm7, %vm659_vm8 }
 0x13d   :  { %v1751_v54 = vsel %vm707_vm5, 1.0, %v1925_v37  ;;  %vm708_vm10 = vmor %vm564_vm12, %vm660_vm15  ;;  %vm518_vm15 = vcmp.eq.s32.totalorder %v2242_v22, %v472_v58 }
 0x13e   :  { %996 = vmatmul.f32.gmra.mxu0 %v1751_v54  ;;  %v2869_v57 = vsel %vm708_vm10, 1.0, %v1925_v37  ;;  %vm709_vm2 = vmor %vm565_vm0, %vm661_vm3  ;;  %1191 = vmatmul.f32.gmra.mxu3 %v1751_v54  ;;  %vm662_vm10 = vcmp.eq.s32.totalorder %v2242_v22, %v616_v60  ;;  %v1342_v54 = vld [vmem:[%s3268_s2 + $0x28] sm:$0xff] }
 0x13f   :  { %1061 = vmatmul.f32.gmra.mxu1 %v2869_v57  ;;  %v2875_v2 = vsel %vm709_vm2, 1.0, %v1925_v37  ;;  %vm280_vm7 = vmor %vm136_vm1, %vm232_vm9 }
 0x140   :  { %1777 = vmatmul.msk.f32.gmra.mxu2 %vm3315_vm13, %v2875_v2  ;;  %vm278_vm12 = vmor %vm134_vm14, %vm230_vm4  ;;  %vm519_vm14 = vcmp.eq.s32.totalorder %v2255_v27, %v472_v58  ;;  %vm663_vm13 = vcmp.eq.s32.totalorder %v2255_v27, %v616_v60  ;;  %1420 = vmatpush.msrb.mxu1 %v1342_v54 }
 0x141   :  { %vm2892_vm0 = vmor %vm135_vm6, %vm231_vm11  ;;  %vm520_vm6 = vcmp.eq.s32.totalorder %v2249_v25, %v472_v58  ;;  %v475_v30 = vpop.permute.xlu2 %474 }
 0x142   :  { %1421 = vmatpush.msrb.mxu1 %v1341_v7  ;;  %v337_v29 = vpop.permute.xlu0 %336 }
 0x143   :  { %v328_v61 = vpop.permute.xlu1 %327 }
 0x144   :  { %vm374_vm3 = vcmp.eq.s32.totalorder %v2242_v22, %v328_v61  ;;  %vm376_vm8 = vcmp.eq.s32.totalorder %v2249_v25, %v328_v61  ;;  %vm375_vm2 = vcmp.eq.s32.totalorder %v2255_v27, %v328_v61  ;;  %v883_v61 = vld [vmem:[%s3267_s1 + $0x208] sm:$0xff]  ;;  %1422 = vmatpush.msrb.mxu1 %v1340_v0 }
 0x145   :  { %vm2896_vm5 = vmor %vm280_vm7, %vm376_vm8  ;;  %vm664_vm7 = vcmp.eq.s32.totalorder %v2249_v25, %v616_v60  ;;  %v851_v60 = vld [vmem:[%s3267_s1 + $0x108] sm:$0xff]  ;;  %1287 = vmatpush.msrb.mxu0 %v883_v61 }
 0x146   :  { %vm422_vm1 = vmor %vm278_vm12, %vm374_vm3  ;;  %1222 = vmatpush.msrb.mxu2 %v851_v60  ;;  %1423 = vmatpush.msrb.mxu1 %v1339_v8 }
 0x147   :  { %vm566_vm9 = vmor %vm422_vm1, %vm518_vm15 }
 0x148   :  { %vm710_vm4 = vmor %vm566_vm9, %vm662_vm10  ;;  %vm234_vm9 = vcmp.eq.s32.totalorder %v2255_v27, %v187_v10 }
 0x149   :  { %v1754_v9 = vsel %vm710_vm4, 1.0, %v1925_v37  ;;  %vm423_vm11 = vmor %vm2892_vm0, %vm375_vm2  ;;  %vm3320_vm0 = vcmask 523264   ;;  %vm233_vm2 = vcmp.eq.s32.totalorder %v2242_v22, %v187_v10 }
 0x14a   :  { %999 = vmatmul.f32.gmra.mxu0 %v1754_v9  ;;  %vm567_vm8 = vmor %vm423_vm11, %vm519_vm14  ;;  %1194 = vmatmul.f32.gmra.mxu3 %v1754_v9  ;;  %v190_v47 = vpop.permute.xlu2 %189 }
 0x14b   :  { %vm711_vm12 = vmor %vm567_vm8, %vm663_vm13 }
 0x14c   :  { %v2916_v11 = vsel %vm711_vm12, 1.0, %v1925_v37  ;;  %vm568_vm3 = vmor %vm2896_vm5, %vm520_vm6  ;;  %v91_v13 = vpop.permute.xlu1 %90  ;;  %vm235_vm5 = vcmp.eq.s32.totalorder %v2249_v25, %v187_v10  ;;  %v1338_v10 = vld [vmem:[%s3268_s2 + $0x8] sm:$0xff] }
 0x14d   :  { %1064 = vmatmul.f32.gmra.mxu1 %v2916_v11  ;;  %vm712_vm15 = vmor %vm568_vm3, %vm664_vm7  ;;  %vm139_vm10 = vcmp.eq.s32.totalorder %v2249_v25, %v91_v13  ;;  %vm137_vm1 = vcmp.eq.s32.totalorder %v2242_v22, %v91_v13  ;;  %vm138_vm14 = vcmp.eq.s32.totalorder %v2255_v27, %v91_v13  ;;  %vm521_vm7 = vcmp.eq.s32.totalorder %v2242_v22, %v475_v30  ;;  %v1337_v13 = vld [vmem:[%s3268_s2] sm:$0xff] }
 0x14e   :  { %v2928_v18 = vsel %vm712_vm15, 1.0, %v1925_v37  ;;  %vm283_vm4 = vmor %vm139_vm10, %vm235_vm5  ;;  %vm665_vm3 = vcmp.eq.s32.totalorder %v2242_v22, %v619_v32  ;;  %vm522_vm10 = vcmp.eq.s32.totalorder %v2255_v27, %v475_v30  ;;  %1424 = vmatpush.msrb.mxu1 %v1338_v10 }
 0x14f   :  { %1778 = vmatmul.msk.f32.gmra.mxu2 %vm3320_vm0, %v2928_v18  ;;  %vm281_vm13 = vmor %vm137_vm1, %vm233_vm2  ;;  %vm666_vm1 = vcmp.eq.s32.totalorder %v2255_v27, %v619_v32 }
 0x150   :  { %vm2959_vm8 = vmor %vm138_vm14, %vm234_vm9  ;;  %vm523_vm9 = vcmp.eq.s32.totalorder %v2249_v25, %v475_v30  ;;  %1425 = vmatpush.msrb.mxu1 %v1337_v13  ;;  %v1356_v30 = vld [vmem:[%s3268_s2 + $0x98] sm:$0xff] }
 0x151   :  { %1487 = vmatpush.msrb.mxu3 %v1356_v30 }
 0x153   :  { %v622_v5 = vpop.permute.xlu2 %621 }
 0x155   :  { %v331_v33 = vpop.permute.xlu1 %330 }
 0x156   :  { %vm377_vm6 = vcmp.eq.s32.totalorder %v2242_v22, %v331_v33  ;;  %vm379_vm11 = vcmp.eq.s32.totalorder %v2249_v25, %v331_v33  ;;  %vm378_vm15 = vcmp.eq.s32.totalorder %v2255_v27, %v331_v33  ;;  %v964_v33 = vpop.f32.mrf.mxu0 }
 0x157   :  { %vm2963_vm12 = vmor %vm283_vm4, %vm379_vm11  ;;  %vm667_vm4 = vcmp.eq.s32.totalorder %v2249_v25, %v619_v32 }
 0x158   :  { %vm425_vm0 = vmor %vm281_vm13, %vm377_vm6 }
 0x159   :  { %vm569_vm5 = vmor %vm425_vm0, %vm521_vm7 }
 0x15a   :  { %vm713_vm2 = vmor %vm569_vm5, %vm665_vm3  ;;  %vm237_vm5 = vcmp.eq.s32.totalorder %v2255_v27, %v190_v47 }
 0x15b   :  { %v1757_v45 = vsel %vm713_vm2, 1.0, %v1925_v37  ;;  %vm426_vm14 = vmor %vm2959_vm8, %vm378_vm15  ;;  %vm238_vm8 = vcmp.eq.s32.totalorder %v2249_v25, %v190_v47  ;;  %vm3325_vm15 = vcmask 523264  }
 0x15c   :  { %1002 = vmatmul.f32.gmra.mxu0 %v1757_v45  ;;  %vm570_vm13 = vmor %vm426_vm14, %vm522_vm10  ;;  %1197 = vmatmul.f32.gmra.mxu3 %v1757_v45  ;;  %v193_v23 = vpop.permute.xlu2 %192  ;;  %v1097_v45 = vpop.f32.mrf.mxu2 }
 0x15d   :  { %vm714_vm6 = vmor %vm570_vm13, %vm666_vm1  ;;  %vm382_vm1 = vcmp.eq.s32.totalorder %v2249_v25, %v334_v59 }
 0x15e   :  { %v2989_v51 = vsel %vm714_vm6, 1.0, %v1925_v37  ;;  %vm571_vm11 = vmor %vm2963_vm12, %vm523_vm9  ;;  %v94_v53 = vpop.permute.xlu1 %93  ;;  %vm236_vm12 = vcmp.eq.s32.totalorder %v2242_v22, %v190_v47  ;;  %vm380_vm9 = vcmp.eq.s32.totalorder %v2242_v22, %v334_v59  ;;  %v967_v28 = vpop.f32.mrf.mxu0 }
 0x15f   :  { %1067 = vmatmul.f32.gmra.mxu1 %v2989_v51  ;;  %vm715_vm7 = vmor %vm571_vm11, %vm667_vm4  ;;  %vm142_vm3 = vcmp.eq.s32.totalorder %v2249_v25, %v94_v53  ;;  %vm140_vm0 = vcmp.eq.s32.totalorder %v2242_v22, %v94_v53  ;;  %vm141_vm10 = vcmp.eq.s32.totalorder %v2255_v27, %v94_v53  ;;  %vm381_vm4 = vcmp.eq.s32.totalorder %v2255_v27, %v334_v59  ;;  %v1035_v53 = vpop.f32.mrf.mxu1 }
 0x160   :  { %v2998_v58 = vsel %vm715_vm7, 1.0, %v1925_v37  ;;  %vm286_vm2 = vmor %vm142_vm3, %vm238_vm8  ;;  %vm668_vm7 = vcmp.eq.s32.totalorder %v2242_v22, %v622_v5  ;;  %v1033_v47 = vadd.f32 %v1032_v44, %v967_v28 }
 0x161   :  { %1779 = vmatmul.msk.f32.gmra.mxu2 %vm3325_vm15, %v2998_v58  ;;  %vm284_vm14 = vmor %vm140_vm0, %vm236_vm12  ;;  %vm669_vm0 = vcmp.eq.s32.totalorder %v2255_v27, %v622_v5 }
 0x162   :  { %vm285_vm13 = vmor %vm141_vm10, %vm237_vm5 }
 0x163   :  { %vm3030_vm6 = vmor %vm286_vm2, %vm382_vm1  ;;  %vm670_vm2 = vcmp.eq.s32.totalorder %v2249_v25, %v622_v5 }
 0x164   :  { %vm428_vm11 = vmor %vm284_vm14, %vm380_vm9  ;;  %v1100_v54 = vpop.f32.mrf.mxu2 }
 0x165   :  { %vm429_vm3 = vmor %vm285_vm13, %vm381_vm4  ;;  %vm3328_vm13 = vcmask 523264   ;;  %v625_v31 = vpop.permute.xlu2 %624 }
 0x166   :  { %v970_v48 = vpop.f32.mrf.mxu0 }
 0x167   :  { %v478_v9 = vpop.permute.xlu1 %477  ;;  %v1036_v59 = vadd.f32 %v1035_v53, %v970_v48 }
 0x168   :  { %vm524_vm8 = vcmp.eq.s32.totalorder %v2242_v22, %v478_v9  ;;  %vm525_vm15 = vcmp.eq.s32.totalorder %v2255_v27, %v478_v9  ;;  %vm526_vm5 = vcmp.eq.s32.totalorder %v2249_v25, %v478_v9 }
 0x169   :  { %vm572_vm12 = vmor %vm428_vm11, %vm524_vm8  ;;  %vm241_vm11 = vcmp.eq.s32.totalorder %v2249_v25, %v193_v23 }
 0x16a   :  { %vm716_vm10 = vmor %vm572_vm12, %vm668_vm7 }
 0x16b   :  { %v1760_v16 = vsel %vm716_vm10, 1.0, %v1925_v37  ;;  %vm573_vm1 = vmor %vm429_vm3, %vm525_vm15  ;;  %vm240_vm3 = vcmp.eq.s32.totalorder %v2255_v27, %v193_v23 }
 0x16c   :  { %1005 = vmatmul.f32.gmra.mxu0 %v1760_v16  ;;  %vm717_vm9 = vmor %vm573_vm1, %vm669_vm0  ;;  %1200 = vmatmul.f32.gmra.mxu3 %v1760_v16  ;;  %vm385_vm0 = vcmp.eq.s32.totalorder %v2249_v25, %v337_v29  ;;  %v1103_v60 = vpop.f32.mrf.mxu2 }
 0x16d   :  { %v3048_v17 = vsel %vm717_vm9, 1.0, %v1925_v37  ;;  %vm574_vm14 = vmor %vm3030_vm6, %vm526_vm5  ;;  %vm239_vm6 = vcmp.eq.s32.totalorder %v2242_v22, %v193_v23  ;;  %vm383_vm5 = vcmp.eq.s32.totalorder %v2242_v22, %v337_v29 }
 0x16e   :  { %1070 = vmatmul.f32.gmra.mxu1 %v3048_v17  ;;  %vm718_vm4 = vmor %vm574_vm14, %vm670_vm2  ;;  %vm384_vm2 = vcmp.eq.s32.totalorder %v2255_v27, %v337_v29  ;;  %v973_v7 = vpop.f32.mrf.mxu0 }
 0x16f   :  { %v3054_v19 = vsel %vm718_vm4, 1.0, %v1925_v37 }
 0x170   :  { %1780 = vmatmul.msk.f32.gmra.mxu2 %vm3328_vm13, %v3054_v19  ;;  %v97_v26 = vpop.permute.xlu1 %96 }
 0x171   :  { %vm145_vm7 = vcmp.eq.s32.totalorder %v2249_v25, %v97_v26  ;;  %vm143_vm8 = vcmp.eq.s32.totalorder %v2242_v22, %v97_v26  ;;  %vm144_vm15 = vcmp.eq.s32.totalorder %v2255_v27, %v97_v26 }
 0x172   :  { %vm289_vm12 = vmor %vm145_vm7, %vm241_vm11  ;;  %vm671_vm7 = vcmp.eq.s32.totalorder %v2242_v22, %v625_v31 }
 0x173   :  { %vm287_vm10 = vmor %vm143_vm8, %vm239_vm6 }
 0x174   :  { %vm288_vm1 = vmor %vm144_vm15, %vm240_vm3  ;;  %vm672_vm3 = vcmp.eq.s32.totalorder %v2255_v27, %v625_v31  ;;  %v1106_v8 = vpop.f32.mrf.mxu2 }
 0x175   :  { %vm433_vm9 = vmor %vm289_vm12, %vm385_vm0  ;;  %vm673_vm0 = vcmp.eq.s32.totalorder %v2249_v25, %v625_v31 }
 0x176   :  { %vm431_vm14 = vmor %vm287_vm10, %vm383_vm5  ;;  %v976_v0 = vpop.f32.mrf.mxu0 }
 0x177   :  { %vm432_vm11 = vmor %vm288_vm1, %vm384_vm2  ;;  %vm3329_vm1 = vcmask 523264  }
 0x179   :  { %v481_v32 = vpop.permute.xlu1 %480 }
 0x17a   :  { %vm527_vm4 = vcmp.eq.s32.totalorder %v2242_v22, %v481_v32  ;;  %vm529_vm13 = vcmp.eq.s32.totalorder %v2249_v25, %v481_v32  ;;  %vm528_vm6 = vcmp.eq.s32.totalorder %v2255_v27, %v481_v32  ;;  %v1030_v25 = vadd.f32 %v1029_v34, %v964_v33 }
 0x17b   :  { %vm577_vm8 = vmor %vm433_vm9, %vm529_vm13 }
 0x17c   :  { %vm575_vm15 = vmor %vm431_vm14, %vm527_vm4  ;;  %v1095_v40 = vadd.f32 %v1094_v39, %v1030_v25  ;;  %v1109_v10 = vpop.f32.mrf.mxu2 }
 0x17d   :  { %vm719_vm12 = vmor %vm575_vm15, %vm671_vm7 }
 0x17e   :  { %v1763_v1 = vsel %vm719_vm12, 1.0, %v1925_v37  ;;  %vm576_vm5 = vmor %vm432_vm11, %vm528_vm6  ;;  %v979_v9 = vpop.f32.mrf.mxu0 }
 0x17f   :  { %1008 = vmatmul.f32.gmra.mxu0 %v1763_v1  ;;  %vm720_vm10 = vmor %vm576_vm5, %vm672_vm3  ;;  %1203 = vmatmul.f32.gmra.mxu3 %v1763_v1 }
 0x180   :  { %v3078_v22 = vsel %vm720_vm10, 1.0, %v1925_v37  ;;  %vm721_vm2 = vmor %vm577_vm8, %vm673_vm0 }
 0x181   :  { %1073 = vmatmul.f32.gmra.mxu1 %v3078_v22  ;;  %v3082_v27 = vsel %vm721_vm2, 1.0, %v1925_v37  ;;  %vm3330_vm9 = vmmov %vm3329_vm1  ;;  %v1098_v37 = vadd.f32 %v1097_v45, %v1033_v47 }
 0x182   :  { %1781 = vmatmul.msk.f32.gmra.mxu2 %vm3329_vm1, %v3082_v27  ;;  %vm3331_vm14 = vmmov %vm3329_vm1 }
 0x183   :  { %vm3332_vm4 = vmmov %vm3329_vm1 }
 0x184   :  { %vm3333_vm13 = vmmov %vm3329_vm1  ;;  %v1112_v23 = vpop.f32.mrf.mxu2 }
 0x185   :  { %vm3334_vm7 = vmmov %vm3329_vm1 }
 0x186   :  { %vm3335_vm11 = vmmov %vm3329_vm1  ;;  %v982_v16 = vpop.f32.mrf.mxu0 }
 0x187   :  { %1782 = vmatmul.msk.f32.vlgmr.msrb.gmra.mxu0 %vm3330_vm9, %v2378_v43  ;;  %v1355_v43 = vld [vmem:[%s3268_s2 + $0x90] sm:$0xff]  ;;  %vm3336_vm6 = vmmov %vm3329_vm1  ;;  %vm1361_vm9 = vcmask 261120  }
 0x188   :  { %1488 = vmatpush.msrb.mxu3 %v1355_v43  ;;  %vm3337_vm8 = vmmov %vm3329_vm1 }
 0x189   :  { %1426 = vmatmul.f32.vlgmr.msrb.gmra.mxu1 %v1095_v40  ;;  %vm3338_vm3 = vmmov %vm3329_vm1 }
 0x18a   :  { %1223 = vmatmul.f32.vlgmr.msrb.gmra.mxu2 %v2361_v42  ;;  %v1101_v42 = vadd.f32 %v1100_v54, %v1036_v59  ;;  %vm3339_vm15 = vmmov %vm3329_vm1 }
 0x18b   :  { %vm3340_vm0 = vmmov %vm3329_vm1 }
 0x18c   :  { %v1115_v30 = vpop.f32.mrf.mxu2  ;;  %vm3341_vm12 = vmmov %vm3340_vm0 }
 0x18d   :  { %vm3342_vm5 = vmmov %vm3340_vm0 }
 0x18e   :  { %v985_v29 = vpop.f32.mrf.mxu0  ;;  %vm3343_vm10 = vmmov %vm3340_vm0 }
 0x18f   :  { %1783 = vmatmul.msk.f32.gmra.mxu0 %vm3331_vm14, %v2426_v49  ;;  %v1038_v49 = vpop.f32.mrf.mxu1  ;;  %vm3344_vm2 = vmmov %vm3340_vm0  ;;  %vm1658_vm14 = vcmask 1041409  }
 0x190   :  { %v1039_v61 = vadd.f32 %v1038_v49, %v973_v7  ;;  %vm3345_vm1 = vmmov %vm3340_vm0 }
 0x191   :  { %1429 = vmatmul.f32.gmra.mxu1 %v1098_v37 }
 0x192   :  { %1226 = vmatmul.f32.gmra.mxu2 %v2409_v46  ;;  %v1104_v46 = vadd.f32 %v1103_v60, %v1039_v61 }
 0x194   :  { %v1118_v34 = vpop.f32.mrf.mxu2 }
 0x196   :  { %v988_v32 = vpop.f32.mrf.mxu0 }
 0x197   :  { %1784 = vmatmul.msk.f32.gmra.mxu0 %vm3332_vm4, %v2472_v56  ;;  %v1041_v5 = vpop.f32.mrf.mxu1  ;;  %vm1660_vm4 = vcmask 1042434  }
 0x198   :  { %v1042_v3 = vadd.f32 %v1041_v5, %v976_v0 }
 0x199   :  { %1432 = vmatmul.f32.gmra.mxu1 %v1101_v42 }
 0x19a   :  { %1229 = vmatmul.f32.gmra.mxu2 %v2461_v55  ;;  %v1107_v56 = vadd.f32 %v1106_v8, %v1042_v3  ;;  %v1159_v3 = vpop.f32.mrf.mxu3 }
 0x19e   :  { %v991_v39 = vpop.f32.mrf.mxu0 }
 0x19f   :  { %1785 = vmatmul.msk.f32.gmra.mxu0 %vm3333_vm13, %v2521_v63  ;;  %v1044_v55 = vpop.f32.mrf.mxu1  ;;  %v1121_v25 = vpop.f32.mrf.mxu2  ;;  %vm1662_vm13 = vcmask 1043459  }
 0x1a0   :  { %v1045_v13 = vadd.f32 %v1044_v55, %v979_v9 }
 0x1a1   :  { %1435 = vmatmul.f32.gmra.mxu1 %v1104_v46 }
 0x1a2   :  { %1232 = vmatmul.f32.gmra.mxu2 %v2508_v62  ;;  %v1110_v63 = vadd.f32 %v1109_v10, %v1045_v13  ;;  %v1162_v10 = vpop.f32.mrf.mxu3 }
 0x1a7   :  { %1786 = vmatmul.msk.f32.gmra.mxu0 %vm3334_vm7, %v2564_v14  ;;  %v1047_v62 = vpop.f32.mrf.mxu1  ;;  %v1354_v14 = vld [vmem:[%s3268_s2 + $0x88] sm:$0xff]  ;;  %vm1664_vm7 = vcmask 1044484  }
 0x1a8   :  { %1489 = vmatpush.msrb.mxu3 %v1354_v14  ;;  %v1048_v26 = vadd.f32 %v1047_v62, %v982_v16 }
 0x1a9   :  { %1438 = vmatmul.f32.gmra.mxu1 %v1107_v56  ;;  %v994_v28 = vpop.f32.mrf.mxu0 }
 0x1aa   :  { %1235 = vmatmul.f32.gmra.mxu2 %v2558_v12  ;;  %v1113_v12 = vadd.f32 %v1112_v23, %v1048_v26 }
 0x1af   :  { %1787 = vmatmul.msk.f32.gmra.mxu0 %vm3335_vm11, %v2609_v15  ;;  %v1050_v15 = vpop.f32.mrf.mxu1  ;;  %vm1666_vm11 = vcmask 1045509  }
 0x1b0   :  { %v1051_v31 = vadd.f32 %v1050_v15, %v985_v29 }
 0x1b1   :  { %1441 = vmatmul.f32.gmra.mxu1 %v1110_v63  ;;  %v1124_v44 = vpop.f32.mrf.mxu2 }
 0x1b2   :  { %1238 = vmatmul.f32.gmra.mxu2 %v2603_v24  ;;  %v1116_v24 = vadd.f32 %v1115_v30, %v1051_v31 }
 0x1b7   :  { %1788 = vmatmul.msk.f32.gmra.mxu0 %vm3336_vm6, %v2657_v38  ;;  %v1053_v33 = vpop.f32.mrf.mxu1  ;;  %vm1668_vm6 = vcmask 1046534  }
 0x1b8   :  { %v1054_v1 = vadd.f32 %v1053_v33, %v988_v32 }
 0x1b9   :  { %1444 = vmatmul.f32.gmra.mxu1 %v1113_v12 }
 0x1ba   :  { %1241 = vmatmul.f32.gmra.mxu2 %v2649_v35  ;;  %v1119_v38 = vadd.f32 %v1118_v34, %v1054_v1 }
 0x1bf   :  { %1789 = vmatmul.msk.f32.gmra.mxu0 %vm3337_vm8, %v2708_v52  ;;  %v1056_v35 = vpop.f32.mrf.mxu1  ;;  %vm1670_vm8 = vcmask 1047559  }
 0x1c0   :  { %v1057_v40 = vadd.f32 %v1056_v35, %v991_v39 }
 0x1c1   :  { %1447 = vmatmul.f32.gmra.mxu1 %v1116_v24 }
 0x1c2   :  { %1244 = vmatmul.f32.gmra.mxu2 %v2697_v50  ;;  %v1122_v52 = vadd.f32 %v1121_v25, %v1057_v40 }
 0x1c7   :  { %1790 = vmatmul.msk.f32.gmra.mxu0 %vm3338_vm3, %v2760_v6  ;;  %v1059_v50 = vpop.f32.mrf.mxu1  ;;  %v1353_v6 = vld [vmem:[%s3268_s2 + $0x80] sm:$0xff] }
 0x1c8   :  { %1490 = vmatpush.msrb.mxu3 %v1353_v6  ;;  %v1060_v45 = vadd.f32 %v1059_v50, %v994_v28 }
 0x1c9   :  { %1450 = vmatmul.f32.gmra.mxu1 %v1119_v38 }
 0x1ca   :  { %1247 = vmatmul.f32.gmra.mxu2 %v2748_v4  ;;  %v1125_v47 = vadd.f32 %v1124_v44, %v1060_v45  ;;  %v997_v4 = vpop.f32.mrf.mxu0 }
 0x1cf   :  { %1791 = vmatmul.msk.f32.gmra.mxu0 %vm3339_vm15, %v2799_v21  ;;  %v1062_v37 = vpop.f32.mrf.mxu1  ;;  %v1127_v21 = vpop.f32.mrf.mxu2 }
 0x1d0   :  { %v1063_v48 = vadd.f32 %v1062_v37, %v997_v4 }
 0x1d1   :  { %1453 = vmatmul.f32.gmra.mxu1 %v1122_v52 }
 0x1d2   :  { %1250 = vmatmul.f32.gmra.mxu2 %v2795_v20  ;;  %v1128_v53 = vadd.f32 %v1127_v21, %v1063_v48  ;;  %v1000_v20 = vpop.f32.mrf.mxu0 }
 0x1d7   :  { %1792 = vmatmul.msk.f32.gmra.mxu0 %vm3340_vm0, %v2839_v41  ;;  %v1065_v43 = vpop.f32.mrf.mxu1  ;;  %v1130_v54 = vpop.f32.mrf.mxu2 }
 0x1d8   :  { %v1066_v59 = vadd.f32 %v1065_v43, %v1000_v20 }
 0x1d9   :  { %1456 = vmatmul.f32.gmra.mxu1 %v1125_v47 }
 0x1da   :  { %1253 = vmatmul.f32.gmra.mxu2 %v2835_v36  ;;  %v1131_v42 = vadd.f32 %v1130_v54, %v1066_v59  ;;  %v1003_v41 = vpop.f32.mrf.mxu0 }
 0x1df   :  { %1793 = vmatmul.msk.f32.gmra.mxu0 %vm3341_vm12, %v2875_v2  ;;  %v1068_v36 = vpop.f32.mrf.mxu1 }
 0x1e0   :  { %v1069_v49 = vadd.f32 %v1068_v36, %v1003_v41 }
 0x1e1   :  { %1459 = vmatmul.f32.gmra.mxu1 %v1128_v53 }
 0x1e2   :  { %1256 = vmatmul.f32.gmra.mxu2 %v2869_v57 }
 0x1e4   :  { %v1133_v7 = vpop.f32.mrf.mxu2 }
 0x1e5   :  { %v1134_v60 = vadd.f32 %v1133_v7, %v1069_v49 }
 0x1e7   :  { %1794 = vmatmul.msk.f32.gmra.mxu0 %vm3342_vm5, %v2928_v18 }
 0x1e9   :  { %1462 = vmatmul.f32.gmra.mxu1 %v1131_v42  ;;  %v1006_v2 = vpop.f32.mrf.mxu0 }
 0x1ea   :  { %1259 = vmatmul.f32.gmra.mxu2 %v2916_v11 }
 0x1eb   :  { %v1071_v57 = vpop.f32.mrf.mxu1 }
 0x1ec   :  { %v1072_v46 = vadd.f32 %v1071_v57, %v1006_v2 }
 0x1ef   :  { %1795 = vmatmul.msk.f32.gmra.mxu0 %vm3343_vm10, %v2998_v58 }
 0x1f1   :  { %1465 = vmatmul.f32.gmra.mxu1 %v1134_v60 }
 0x1f2   :  { %1262 = vmatmul.f32.gmra.mxu2 %v2989_v51 }
 0x1f3   :  { %v1136_v61 = vpop.f32.mrf.mxu2 }
 0x1f4   :  { %v1137_v0 = vadd.f32 %v1136_v61, %v1072_v46 }
 0x1f7   :  { %1796 = vmatmul.msk.f32.gmra.mxu0 %vm3344_vm2, %v3054_v19 }
 0x1f9   :  { %1468 = vmatmul.f32.gmra.mxu1 %v1137_v0 }
 0x1fa   :  { %1265 = vmatmul.f32.gmra.mxu2 %v3048_v17 }
 0x1fc   :  { %v1009_v11 = vpop.f32.mrf.mxu0 }
 0x1fe   :  { %v1074_v18 = vpop.f32.mrf.mxu1 }
 0x1ff   :  { %1797 = vmatmul.msk.f32.gmra.mxu0 %vm3345_vm1, %v3082_v27  ;;  %v1075_v58 = vadd.f32 %v1074_v18, %v1009_v11 }
 0x202   :  { %1268 = vmatmul.f32.gmra.mxu2 %v3078_v22  ;;  %v1165_v22 = vpop.f32.mrf.mxu3 }
 0x204   :  { %v1289_v5 = vpop.f32.mrf.mxu0 }
 0x205   :  { %v1139_v8 = vpop.f32.mrf.mxu2 }
 0x206   :  { %v1140_v51 = vadd.f32 %v1139_v8, %v1075_v58 }
 0x208   :  { %1471 = vmatmul.f32.gmra.mxu1 %v1140_v51 }
 0x20a   :  { %v1168_v26 = vpop.f32.mrf.mxu3 }
 0x20c   :  { %v1292_v56 = vpop.f32.mrf.mxu0 }
 0x20d   :  { %v1224_v9 = vpop.f32.mrf.mxu2 }
 0x20e   :  { %v1225_v55 = vadd.f32 %v1224_v9, %v1159_v3  ;;  %v1427_v9 = vpop.f32.mrf.mxu1 }
 0x210   :  { %v1290_v19 = vadd.f32 %v1289_v5, %v1225_v55 }
 0x212   :  { %1798 = vmatmul.msk.f32.vlgmr.msrb.gmra.mxu3 %vm1361_vm9, %v1290_v19  ;;  %v1171_v31 = vpop.f32.mrf.mxu3 }
 0x214   :  { %v1295_v17 = vpop.f32.mrf.mxu0 }
 0x215   :  { %v1227_v13 = vpop.f32.mrf.mxu2 }
 0x216   :  { %v1228_v27 = vadd.f32 %v1227_v13, %v1162_v10 }
 0x218   :  { %v1293_v63 = vadd.f32 %v1292_v56, %v1228_v27 }
 0x21a   :  { %1799 = vmatmul.msk.f32.gmra.mxu3 %vm1361_vm9, %v1293_v63  ;;  %v1174_v1 = vpop.f32.mrf.mxu3 }
 0x21c   :  { %v1298_v16 = vpop.f32.mrf.mxu0 }
 0x21d   :  { %v1230_v62 = vpop.f32.mrf.mxu2 }
 0x21e   :  { %v1231_v14 = vadd.f32 %v1230_v62, %v1165_v22  ;;  %v1430_v22 = vpop.f32.mrf.mxu1 }
 0x220   :  { %v1296_v23 = vadd.f32 %v1295_v17, %v1231_v14 }
 0x222   :  { %1800 = vmatmul.msk.f32.gmra.mxu3 %vm1361_vm9, %v1296_v23  ;;  %v1177_v40 = vpop.f32.mrf.mxu3 }
 0x224   :  { %v1301_v12 = vpop.f32.mrf.mxu0 }
 0x225   :  { %v1233_v29 = vpop.f32.mrf.mxu2 }
 0x226   :  { %v1234_v15 = vadd.f32 %v1233_v29, %v1168_v26  ;;  %v1433_v29 = vpop.f32.mrf.mxu1 }
 0x228   :  { %v1299_v30 = vadd.f32 %v1298_v16, %v1234_v15  ;;  %v3162_v15 = vld [vmem:[%s3269_s3] ss:$0 sm:$0xff] }
 0x22a   :  { %1801 = vmatmul.msk.f32.gmra.mxu3 %vm1361_vm9, %v1299_v30  ;;  %v1180_v44 = vpop.f32.mrf.mxu3  ;;  %v1645_v30 = vld [vmem:[%s3271_s5 + $0x78] sm:$0xff] }
 0x22b   :  { %1673 = vmatpush.msra.mxu2 %v1645_v30 }
 0x22c   :  { %v1304_v24 = vpop.f32.mrf.mxu0 }
 0x22d   :  { %v1236_v32 = vpop.f32.mrf.mxu2 }
 0x22e   :  { %v1237_v33 = vadd.f32 %v1236_v32, %v1171_v31  ;;  %v1644_v31 = vld [vmem:[%s3271_s5 + $0x70] sm:$0xff]  ;;  %v1428_v32 = vadd.f32 %v3162_v15, %v1427_v9 }
 0x22f   :  { %1674 = vmatpush.msra.mxu2 %v1644_v31 }
 0x230   :  { %v1302_v34 = vadd.f32 %v1301_v12, %v1237_v33 }
 0x232   :  { %1802 = vmatmul.msk.f32.gmra.mxu3 %vm1361_vm9, %v1302_v34  ;;  %v1183_v21 = vpop.f32.mrf.mxu3 }
 0x234   :  { %v1307_v38 = vpop.f32.mrf.mxu0 }
 0x235   :  { %v1239_v39 = vpop.f32.mrf.mxu2 }
 0x236   :  { %v1240_v35 = vadd.f32 %v1239_v39, %v1174_v1  ;;  %v1431_v1 = vadd.f32 %v3162_v15, %v1430_v22  ;;  %v1639_v22 = vld [vmem:[%s3271_s5 + $0x48] sm:$0xff] }
 0x238   :  { %v1305_v25 = vadd.f32 %v1304_v24, %v1240_v35  ;;  %v1436_v24 = vpop.f32.mrf.mxu1 }
 0x23a   :  { %1803 = vmatmul.msk.f32.gmra.mxu3 %vm1361_vm9, %v1305_v25  ;;  %v1186_v54 = vpop.f32.mrf.mxu3 }
 0x23c   :  { %v1310_v52 = vpop.f32.mrf.mxu0 }
 0x23d   :  { %v1242_v28 = vpop.f32.mrf.mxu2 }
 0x23e   :  { %v1243_v50 = vadd.f32 %v1242_v28, %v1177_v40  ;;  %v3175_v40 = vld [vmem:[%s3270_s4] sm:$0xff] }
 0x240   :  { %v1308_v6 = vadd.f32 %v1307_v38, %v1243_v50  ;;  %v1439_v38 = vpop.f32.mrf.mxu1 }
 0x242   :  { %1804 = vmatmul.msk.f32.gmra.mxu3 %vm1361_vm9, %v1308_v6  ;;  %v1189_v7 = vpop.f32.mrf.mxu3 }
 0x244   :  { %v1313_v45 = vpop.f32.mrf.mxu0 }
 0x245   :  { %v1245_v47 = vpop.f32.mrf.mxu2 }
 0x246   :  { %v1246_v4 = vadd.f32 %v1245_v47, %v1180_v44  ;;  %v1643_v44 = vld [vmem:[%s3271_s5 + $0x68] sm:$0xff]  ;;  %v1434_v47 = vadd.f32 %v3162_v15, %v1433_v29 }
 0x247   :  { %1675 = vmatpush.msra.mxu2 %v1643_v44  ;;  %v1637_v44 = vld [vmem:[%s3271_s5 + $0x38] sm:$0xff] }
 0x248   :  { %v1311_v37 = vadd.f32 %v1310_v52, %v1246_v4  ;;  %v3180_v52 = vld [vmem:[%s3270_s4 + $0x8] sm:$0xff]  ;;  %s1707_s4 = sshll.u32 %s1926_s21, 4  ;;  %s1708_s4 = int_to_ptr.vmem [resolvable:$true] %s1707_s4 }
 0x24a   :  { %1805 = vmatmul.msk.f32.gmra.mxu3 %vm1361_vm9, %v1311_v37  ;;  %v1192_v61 = vpop.f32.mrf.mxu3 }
 0x24c   :  { %v1316_v48 = vpop.f32.mrf.mxu0 }
 0x24d   :  { %v1248_v53 = vpop.f32.mrf.mxu2 }
 0x24e   :  { %v1249_v20 = vadd.f32 %v1248_v53, %v1183_v21  ;;  %v1437_v53 = vadd.f32 %v3162_v15, %v1436_v24 }
 0x250   :  { %v1314_v43 = vadd.f32 %v1313_v45, %v1249_v20  ;;  %v1642_v45 = vld [vmem:[%s3271_s5 + $0x60] sm:$0xff] }
 0x251   :  { %1676 = vmatpush.msra.mxu2 %v1642_v45  ;;  %v1636_v45 = vld [vmem:[%s3271_s5 + $0x30] sm:$0xff] }
 0x252   :  { %1806 = vmatmul.msk.f32.gmra.mxu3 %vm1361_vm9, %v1314_v43  ;;  %v1195_v58 = vpop.f32.mrf.mxu3 }
 0x254   :  { %v1319_v42 = vpop.f32.mrf.mxu0 }
 0x255   :  { %v1251_v59 = vpop.f32.mrf.mxu2 }
 0x256   :  { %v1252_v41 = vadd.f32 %v1251_v59, %v1186_v54 }
 0x258   :  { %v1317_v36 = vadd.f32 %v1316_v48, %v1252_v41  ;;  %v1442_v48 = vpop.f32.mrf.mxu1 }
 0x25a   :  { %1807 = vmatmul.msk.f32.gmra.mxu3 %vm1361_vm9, %v1317_v36  ;;  %v1198_v56 = vpop.f32.mrf.mxu3 }
 0x25c   :  { %v1322_v2 = vpop.f32.mrf.mxu0 }
 0x25d   :  { %v1254_v49 = vpop.f32.mrf.mxu2 }
 0x25e   :  { %v1255_v60 = vadd.f32 %v1254_v49, %v1189_v7 }
 0x260   :  { %v1320_v57 = vadd.f32 %v1319_v42, %v1255_v60  ;;  %v1445_v36 = vpop.f32.mrf.mxu1  ;;  %v1641_v60 = vld [vmem:[%s3271_s5 + $0x58] sm:$0xff] }
 0x261   :  { %1677 = vmatpush.msra.mxu2 %v1641_v60 }
 0x262   :  { %1808 = vmatmul.msk.f32.gmra.mxu3 %vm1361_vm9, %v1320_v57  ;;  %v1201_v17 = vpop.f32.mrf.mxu3  ;;  %v1440_v57 = vadd.f32 %v3162_v15, %v1439_v38 }
 0x264   :  { %v1325_v18 = vpop.f32.mrf.mxu0 }
 0x265   :  { %v1257_v46 = vpop.f32.mrf.mxu2 }
 0x266   :  { %v1258_v0 = vadd.f32 %v1257_v46, %v1192_v61 }
 0x268   :  { %v1323_v11 = vadd.f32 %v1322_v2, %v1258_v0  ;;  %v1640_v2 = vld [vmem:[%s3271_s5 + $0x50] sm:$0xff] }
 0x269   :  { %1678 = vmatpush.msra.mxu2 %v1640_v2 }
 0x26a   :  { %1809 = vmatmul.msk.f32.gmra.mxu3 %vm1361_vm9, %v1323_v11  ;;  %v1204_v62 = vpop.f32.mrf.mxu3 }
 0x26b   :  { %1679 = vmatpush.msra.mxu2 %v1639_v22 }
 0x26c   :  { %v1328_v3 = vpop.f32.mrf.mxu0 }
 0x26d   :  { %v1260_v5 = vpop.f32.mrf.mxu2 }
 0x26e   :  { %v1261_v8 = vadd.f32 %v1260_v5, %v1195_v58 }
 0x270   :  { %v1326_v51 = vadd.f32 %v1325_v18, %v1261_v8 }
 0x272   :  { %1810 = vmatmul.msk.f32.gmra.mxu3 %vm1361_vm9, %v1326_v51  ;;  %v1448_v51 = vpop.f32.mrf.mxu1 }
 0x274   :  { %v1331_v13 = vpop.f32.mrf.mxu0 }
 0x275   :  { %v1263_v55 = vpop.f32.mrf.mxu2 }
 0x276   :  { %v1264_v19 = vadd.f32 %v1263_v55, %v1198_v56 }
 0x278   :  { %v1329_v10 = vadd.f32 %v1328_v3, %v1264_v19  ;;  %v1443_v3 = vadd.f32 %v3162_v15, %v1442_v48 }
 0x27a   :  { %1811 = vmatmul.msk.f32.gmra.mxu3 %vm1361_vm9, %v1329_v10  ;;  %v1451_v29 = vpop.f32.mrf.mxu1 }
 0x27c   :  { %v1334_v26 = vpop.f32.mrf.mxu0 }
 0x27d   :  { %v1266_v27 = vpop.f32.mrf.mxu2 }
 0x27e   :  { %v1267_v63 = vadd.f32 %v1266_v27, %v1201_v17 }
 0x280   :  { %v1332_v16 = vadd.f32 %v1331_v13, %v1267_v63 }
 0x282   :  { %1812 = vmatmul.msk.f32.gmra.mxu3 %vm1361_vm9, %v1332_v16  ;;  %v1638_v16 = vld [vmem:[%s3271_s5 + $0x40] sm:$0xff] }
 0x283   :  { %1680 = vmatpush.msra.mxu2 %v1638_v16 }
 0x285   :  { %v1269_v14 = vpop.f32.mrf.mxu2  ;;  %1681 = vmatpush.msra.mxu2 %v1637_v44 }
 0x286   :  { %v1270_v23 = vadd.f32 %v1269_v14, %v1204_v62 }
 0x287   :  { %1682 = vmatpush.msra.mxu2 %v1636_v45 }
 0x288   :  { %v1335_v12 = vadd.f32 %v1334_v26, %v1270_v23  ;;  %v1446_v26 = vadd.f32 %v3162_v15, %v1445_v36 }
 0x28a   :  { %1813 = vmatmul.msk.f32.gmra.mxu3 %vm1361_vm9, %v1335_v12 }
 0x295   :  { %v1492_v33 = vpop.f32.mrf.mxu3 }
 0x296   :  { %v1493_v34 = vadd.f32 %v1492_v33, %v1428_v32 }
 0x298   :  { %v1540_v35 = vmax.f32 %v1493_v34, 0.0  ;;  %v1449_v34 = vadd.f32 %v3162_v15, %v1448_v51 }
 0x29a   :  { %v1558_v50 = vmul.f32 %v3175_v40, %v1540_v35 }
 0x29d   :  { %v1495_v39 = vpop.f32.mrf.mxu3 }
 0x29e   :  { %v1496_v25 = vadd.f32 %v1495_v39, %v1431_v1 }
 0x2a0   :  { %v1541_v28 = vmax.f32 %v1496_v25, 0.0 }
 0x2a2   :  { %v1559_v6 = vmul.f32 %v3180_v52, %v1541_v28  ;;  %v1454_v28 = vpop.f32.mrf.mxu1 }
 0x2a4   :  { %v1574_v4 = vmax.f32 %v1558_v50, %v1559_v6 }
 0x2a5   :  { %v1498_v37 = vpop.f32.mrf.mxu3 }
 0x2a6   :  { %v1499_v21 = vadd.f32 %v1498_v37, %v1434_v47  ;;  %v1575_v20 = vrot.slane %v1574_v4, 4 }
 0x2a8   :  { %v1542_v54 = vmax.f32 %v1499_v21, 0.0  ;;  %v1576_v42 = vmax.f32 %v1574_v4, %v1575_v20 }
 0x2aa   :  { %v1560_v7 = vmul.f32 %v3175_v40, %v1542_v54  ;;  %v1577_v61 = vrot.slane %v1576_v42, 2 }
 0x2ac   :  { %v1578_v58 = vmax.f32 %v1576_v42, %v1577_v61 }
 0x2ad   :  { %v1501_v43 = vpop.f32.mrf.mxu3 }
 0x2ae   :  { %v1502_v59 = vadd.f32 %v1501_v43, %v1437_v53  ;;  %v1579_v56 = vrot.slane %v1578_v58, 1  ;;  %v1457_v43 = vpop.f32.mrf.mxu1 }
 0x2b0   :  { %v1543_v41 = vmax.f32 %v1502_v59, 0.0  ;;  %v1580_v13 = vmax.f32 %v1578_v58, %v1579_v56  ;;  %v1458_v56 = vadd.f32 %v3162_v15, %v1457_v43 }
 0x2b2   :  { %v1561_v49 = vmul.f32 %v3180_v52, %v1543_v41 }
 0x2b4   :  { %v1581_v46 = vmax.f32 %v1560_v7, %v1561_v49  ;;  %v1635_v7 = vld [vmem:[%s3271_s5 + $0x28] sm:$0xff]  ;;  %v1634_v49 = vld [vmem:[%s3271_s5 + $0x20] sm:$0xff] }
 0x2b5   :  { %v1504_v0 = vpop.f32.mrf.mxu3  ;;  %1683 = vmatpush.msra.mxu2 %v1635_v7 }
 0x2b6   :  { %v1582_v11 = vrot.slane %v1581_v46, 4  ;;  %v1505_v18 = vadd.f32 %v1504_v0, %v1440_v57  ;;  %v1460_v2 = vpop.f32.mrf.mxu1  ;;  %v1633_v0 = vld [vmem:[%s3271_s5 + $0x18] sm:$0xff] }
 0x2b7   :  { %1684 = vmatpush.msra.mxu2 %v1634_v49 }
 0x2b8   :  { %v1583_v5 = vmax.f32 %v1581_v46, %v1582_v11  ;;  %v1544_v10 = vmax.f32 %v1505_v18, 0.0  ;;  %v1632_v11 = vld [vmem:[%s3271_s5 + $0x10] sm:$0xff]  ;;  %v1455_v18 = vadd.f32 %v3162_v15, %v1454_v28 }
 0x2b9   :  { %1685 = vmatpush.msra.mxu2 %v1633_v0 }
 0x2ba   :  { %v1584_v8 = vrot.slane %v1583_v5, 2  ;;  %v1562_v14 = vmul.f32 %v3175_v40, %v1544_v10 }
 0x2bb   :  { %1686 = vmatpush.msra.mxu2 %v1632_v11 }
 0x2bc   :  { %v1585_v9 = vmax.f32 %v1583_v5, %v1584_v8  ;;  %v1461_v5 = vadd.f32 %v3162_v15, %v1460_v2  ;;  %v1452_v8 = vadd.f32 %v3162_v15, %v1451_v29 }
 0x2bd   :  { %v1507_v55 = vpop.f32.mrf.mxu3 }
 0x2be   :  { %v1586_v19 = vrot.slane %v1585_v9, 1  ;;  %v1508_v17 = vadd.f32 %v1507_v55, %v1443_v3  ;;  %v1463_v61 = vpop.f32.mrf.mxu1 }
 0x2bf   :  { %v1464_v55 = vadd.f32 %v3162_v15, %v1463_v61 }
 0x2c0   :  { %v1587_v27 = vmax.f32 %v1585_v9, %v1586_v19  ;;  %v1545_v63 = vmax.f32 %v1508_v17, 0.0 }
 0x2c2   :  { %v1659_v62 = vsel %vm1658_vm14, %v1587_v27, %v1580_v13  ;;  %v1563_v23 = vmul.f32 %v3180_v52, %v1545_v63 }
 0x2c4   :  { %v1588_v12 = vmax.f32 %v1562_v14, %v1563_v23  ;;  %v1631_v23 = vld [vmem:[%s3271_s5 + $0x8] sm:$0xff] }
 0x2c5   :  { %v1510_v30 = vpop.f32.mrf.mxu3  ;;  %1687 = vmatpush.msra.mxu2 %v1631_v23 }
 0x2c6   :  { %v1589_v31 = vrot.slane %v1588_v12, 4  ;;  %v1511_v24 = vadd.f32 %v1510_v30, %v1446_v26  ;;  %v1466_v51 = vpop.f32.mrf.mxu1  ;;  %v1630_v26 = vld [vmem:[%s3271_s5] sm:$0xff] }
 0x2c7   :  { %v1467_v27 = vadd.f32 %v3162_v15, %v1466_v51  ;;  %1688 = vmatpush.msra.mxu2 %v1630_v26 }
 0x2c8   :  { %v1590_v32 = vmax.f32 %v1588_v12, %v1589_v31  ;;  %v1546_v35 = vmax.f32 %v1511_v24, 0.0 }
 0x2ca   :  { %v1591_v33 = vrot.slane %v1590_v32, 2  ;;  %v1564_v4 = vmul.f32 %v3175_v40, %v1546_v35 }
 0x2cc   :  { %v1592_v1 = vmax.f32 %v1590_v32, %v1591_v33 }
 0x2cd   :  { %v1513_v38 = vpop.f32.mrf.mxu3 }
 0x2ce   :  { %v1593_v39 = vrot.slane %v1592_v1, 1  ;;  %v1514_v25 = vadd.f32 %v1513_v38, %v1449_v34  ;;  %v1469_v24 = vpop.f32.mrf.mxu1 }
 0x2d0   :  { %v1594_v50 = vmax.f32 %v1592_v1, %v1593_v39  ;;  %v1547_v6 = vmax.f32 %v1514_v25, 0.0  ;;  %v1694_v39 = vld [vmem:[%s3273_s7] sm:$0xff] }
 0x2d1   :  { %1697 = vperm.xlu0 %1891, %v1694_v39  }
 0x2d2   :  { %v1661_v47 = vsel %vm1660_vm4, %v1594_v50, %v1659_v62  ;;  %v1565_v37 = vmul.f32 %v3180_v52, %v1547_v6  ;;  %v1470_v6 = vadd.f32 %v3162_v15, %v1469_v24 }
 0x2d4   :  { %v1595_v21 = vmax.f32 %v1564_v4, %v1565_v37 }
 0x2d5   :  { %v1516_v48 = vpop.f32.mrf.mxu3 }
 0x2d6   :  { %v1596_v53 = vrot.slane %v1595_v21, 4  ;;  %v1517_v19 = vadd.f32 %v1516_v48, %v1452_v8  ;;  %v1472_v45 = vpop.f32.mrf.mxu1 }
 0x2d8   :  { %v1597_v20 = vmax.f32 %v1595_v21, %v1596_v53  ;;  %v1548_v22 = vmax.f32 %v1517_v19, 0.0  ;;  %v1473_v21 = vadd.f32 %v3162_v15, %v1472_v45 }
 0x2da   :  { %v1598_v54 = vrot.slane %v1597_v20, 2  ;;  %v1566_v32 = vmul.f32 %v3175_v40, %v1548_v22 }
 0x2dc   :  { %v1599_v59 = vmax.f32 %v1597_v20, %v1598_v54 }
 0x2dd   :  { %v1519_v42 = vpop.f32.mrf.mxu3 }
 0x2de   :  { %v1600_v41 = vrot.slane %v1599_v59, 1  ;;  %v1520_v3 = vadd.f32 %v1519_v42, %v1455_v18 }
 0x2e0   :  { %v1601_v36 = vmax.f32 %v1599_v59, %v1600_v41  ;;  %v1549_v17 = vmax.f32 %v1520_v3, 0.0 }
 0x2e2   :  { %v3226_v60 = vsel %vm1662_vm13, %v1601_v36, %v1661_v47  ;;  %v1567_v12 = vmul.f32 %v3180_v52, %v1549_v17  ;;  %v1893_v17 = vld [vmem:[%s3272_s6] ss:$0 sm:$0xff] }
 0x2e4   :  { %v1602_v1 = vmax.f32 %v1566_v32, %v1567_v12 }
 0x2e5   :  { %v1522_v57 = vpop.f32.mrf.mxu3 }
 0x2e6   :  { %v1523_v10 = vadd.f32 %v1522_v57, %v1458_v56  ;;  %v1603_v50 = vrot.slane %v1602_v1, 4 }
 0x2e8   :  { %v1550_v62 = vmax.f32 %v1523_v10, 0.0  ;;  %v1604_v37 = vmax.f32 %v1602_v1, %v1603_v50 }
 0x2ea   :  { %v1568_v33 = vmul.f32 %v3175_v40, %v1550_v62  ;;  %v1605_v59 = vrot.slane %v1604_v37, 2 }
 0x2ec   :  { %v1606_v2 = vmax.f32 %v1604_v37, %v1605_v59 }
 0x2ed   :  { %v1525_v46 = vpop.f32.mrf.mxu3 }
 0x2ee   :  { %v1526_v9 = vadd.f32 %v1525_v46, %v1461_v5  ;;  %v1607_v11 = vrot.slane %v1606_v2, 1 }
 0x2f0   :  { %v1551_v63 = vmax.f32 %v1526_v9, 0.0  ;;  %v1608_v8 = vmax.f32 %v1606_v2, %v1607_v11 }
 0x2f2   :  { %v1569_v30 = vmul.f32 %v3180_v52, %v1551_v63 }
 0x2f4   :  { %v1609_v35 = vmax.f32 %v1568_v33, %v1569_v30 }
 0x2f5   :  { %v1528_v58 = vpop.f32.mrf.mxu3 }
 0x2f6   :  { %v1529_v13 = vadd.f32 %v1528_v58, %v1464_v55  ;;  %v1610_v44 = vrot.slane %v1609_v35, 4 }
 0x2f8   :  { %v1552_v29 = vmax.f32 %v1529_v13, 0.0  ;;  %v1611_v48 = vmax.f32 %v1609_v35, %v1610_v44 }
 0x2fa   :  { %v1570_v38 = vmul.f32 %v3175_v40, %v1552_v29  ;;  %v1612_v42 = vrot.slane %v1611_v48, 2 }
 0x2fc   :  { %v1613_v57 = vmax.f32 %v1611_v48, %v1612_v42 }
 0x2fd   :  { %v1531_v16 = vpop.f32.mrf.mxu3 }
 0x2fe   :  { %v1532_v14 = vadd.f32 %v1531_v16, %v1467_v27  ;;  %v1614_v15 = vrot.slane %v1613_v57, 1 }
 0x300   :  { %v1553_v31 = vmax.f32 %v1532_v14, 0.0  ;;  %v1615_v51 = vmax.f32 %v1613_v57, %v1614_v15 }
 0x302   :  { %v1571_v34 = vmul.f32 %v3180_v52, %v1553_v31 }
 0x304   :  { %v1616_v25 = vmax.f32 %v1570_v38, %v1571_v34 }
 0x305   :  { %v1534_v28 = vpop.f32.mrf.mxu3 }
 0x306   :  { %v1617_v47 = vrot.slane %v1616_v25, 4  ;;  %v1535_v4 = vadd.f32 %v1534_v28, %v1470_v6 }
 0x308   :  { %v1618_v53 = vmax.f32 %v1616_v25, %v1617_v47  ;;  %v1554_v43 = vmax.f32 %v1535_v4, 0.0 }
 0x30a   :  { %v1619_v36 = vrot.slane %v1618_v53, 2  ;;  %v1572_v7 = vmul.f32 %v3175_v40, %v1554_v43  ;;  %v1665_v40 = vsel %vm1664_vm7, %v1608_v8, %v3226_v60 }
 0x30b   :  { %v1667_v55 = vsel %vm1666_vm11, %v1615_v51, %v1665_v40 }
 0x30c   :  { %v1620_v46 = vmax.f32 %v1618_v53, %v1619_v36 }
 0x30d   :  { %v1537_v20 = vpop.f32.mrf.mxu3 }
 0x30e   :  { %v1538_v54 = vadd.f32 %v1537_v20, %v1473_v21  ;;  %v1621_v58 = vrot.slane %v1620_v46, 1 }
 0x310   :  { %v1555_v41 = vmax.f32 %v1538_v54, 0.0  ;;  %v1622_v56 = vmax.f32 %v1620_v46, %v1621_v58 }
 0x312   :  { %v1573_v49 = vmul.f32 %v3180_v52, %v1555_v41  ;;  %v1669_v19 = vsel %vm1668_vm6, %v1622_v56, %v1667_v55 }
 0x314   :  { %v1623_v61 = vmax.f32 %v1572_v7, %v1573_v49 }
 0x316   :  { %v1624_v0 = vrot.slane %v1623_v61, 4 }
 0x318   :  { %v1625_v18 = vmax.f32 %v1623_v61, %v1624_v0 }
 0x31a   :  { %v1626_v5 = vrot.slane %v1625_v18, 2 }
 0x31c   :  { %v1627_v3 = vmax.f32 %v1625_v18, %v1626_v5 }
 0x31e   :  { %v1628_v9 = vrot.slane %v1627_v3, 1 }
 0x320   :  { %v1629_v52 = vmax.f32 %v1627_v3, %v1628_v9 }
 0x322   :  { %v1671_v10 = vsel %vm1670_vm8, %v1629_v52, %v1669_v19 }
 0x323   :  { %1689 = vmatmul.f32.vlgmr.msra.gmra.mxu2 %v1671_v10 }
 0x343   :  { %v1698_v63 = vpop.permute.xlu0 %1697 }
 0x3a6   :  { %v1690_v13 = vpop.f32.mrf.mxu2 }
 0x3a7   :  { %v1691_v27 = vadd.f32 %v1893_v17, %v1690_v13 }
 0x3a9   :  { %v1693_v60 = vmax.f32 %v1691_v27, 0.0 }
 0x3ab   :  { %v1700_v22 = vmul.f32 %v1698_v63, %v1693_v60 }
 0x3ad   :  { %1701 = vst [vmem:[#allocation2] sm:$0xff] %v1700_v22 }
 0x3ae   :  { %1712 = dma.vmem_to_hbm [thread:$0]  %s1708_s4, 128, %s1710_s24, [#allocation3]  }
 0x3af   :  { %1918 = dma.done.wait [#allocation3], 128  }
 0x3b0   :  { %1919 = vsyncadd [#allocation3], 4294967168 }
 0x3b1   :  { %1717 = vsyncpa [#allocation3], 1 }

</bundles_post_ra>
